<compile_context>
chip_gen: v7x
topology: tpu7x:2x2x1
jax: 0.10.0
libtpu: 0.0.40
codegen_flags: <defaults>
</compile_context>

<pallas_src>
import jax
import jax.numpy as jnp
from jax import lax
from jax.experimental import pallas as pl
from jax.experimental.pallas import tpu as pltpu

BN_EPS = 1e-5
SUBLANE = 8
ELEMWISE_TM_MAX = 2048      # elementwise pass-2 tiles, decoupled from the conv tiles


# ------------------------------ small helpers ------------------------------ #

def _round_up(x, k):
    return (x + k - 1) // k * k


def _cpad(c):
    # 128-lane padding; 256-aligned once channels are MXU-relevant (v6e/v7x 256x256 MXU)
    return _round_up(c, 256) if c > 128 else 128


def _pad_to(a, shape):
    return jnp.pad(a, [(0, s - d) for d, s in zip(a.shape, shape)])


def _pick_tiles(m, tmax):
    """Tile rows so that (a) >=2 grid steps when possible (v7x megacore) and
    (b) padded-M waste stays small."""
    steps = max(2, pl.cdiv(m, tmax)) if m > 2 * SUBLANE else 1
    tm = _round_up(pl.cdiv(m, steps), SUBLANE)
    steps = pl.cdiv(m, tm)
    return tm, steps, tm * steps


def _vmem_limit(need_bytes):
    # need + ~25% headroom; floor at the 16 MiB default; cap below v7x's 64 MiB physical
    return int(min(max(int(need_bytes * 1.25), 16 * 2 ** 20), 48 * 2 ** 20))


# ------------------------------ Pallas kernels ------------------------------ #

def _make_conv1_kernel(ho, wo, s, m1, m1p, cinp, coutp):
    """Conv1 (3x3, stride s) on one phase-decomposed padded image + BN-stat partials."""

    def kernel(x_ref, w_ref, y_ref, sum_ref, ssq_ref):
        # x_ref : (s*s, Hph, Wph, cinp) f32  stride-phase-decomposed padded image
        # w_ref : (9, cinp, coutp)      bf16 resident weights (tap-major, HWIO order)
        # y_ref : (m1p, coutp)          bf16 pre-BN conv output (flattened Ho*Wo rows)
        acc = jnp.zeros((m1, coutp), jnp.float32)
        for dh in range(3):
            for dw in range(3):
                ph = (dh % s) * s + (dw % s)
                win = x_ref[ph, dh // s:dh // s + ho, dw // s:dw // s + wo, :]
                # f32 window -> clean (8-aligned) collapse -> bf16 MXU operand
                win = win.reshape(m1, cinp).astype(jnp.bfloat16)
                acc += jnp.dot(win, w_ref[dh * 3 + dw],
                               preferred_element_type=jnp.float32)
        # exact batch-stat partials from the f32 accumulator (before the bf16 cast)
        sum_ref[...] = jnp.sum(acc, axis=0, keepdims=True)
        ssq_ref[...] = jnp.sum(acc * acc, axis=0, keepdims=True)
        if m1p != m1:
            acc = jnp.concatenate(
                [acc, jnp.zeros((m1p - m1, coutp), jnp.float32)], axis=0)
        y_ref[...] = acc.astype(y_ref.dtype)

    return kernel


def _make_bn_relu_conv2_kernel(ho, wo, m1, m1p, c1p, c2p):
    """Fused bn1 + ReLU + conv2 (3x3, stride 1) + bn2 batch-stat partials (one image)."""

    def kernel(y1_ref, s1_ref, b1_ref, w_ref, y2_ref, sum_ref, ssq_ref, pad_buf):
        # y1_ref : (m1p, c1p) bf16 pre-BN conv1 output; s1/b1: (1, c1p) f32 BN affine
        # pad_buf: (ho+2, wo+2, c1p) f32 VMEM scratch = zero-bordered conv2 input image
        a = y1_ref[...][:m1].astype(jnp.float32) * s1_ref[...] + b1_ref[...]
        a = jnp.maximum(a, 0.0)
        pad_buf[...] = jnp.zeros((ho + 2, wo + 2, c1p), jnp.float32)
        pad_buf[1:1 + ho, 1:1 + wo, :] = a.reshape(ho, wo, c1p)
        acc = jnp.zeros((m1, c2p), jnp.float32)
        for dh in range(3):
            for dw in range(3):
                win = pad_buf[dh:dh + ho, dw:dw + wo, :]
                win = win.reshape(m1, c1p).astype(jnp.bfloat16)
                acc += jnp.dot(win, w_ref[dh * 3 + dw],
                               preferred_element_type=jnp.float32)
        sum_ref[...] = jnp.sum(acc, axis=0, keepdims=True)
        ssq_ref[...] = jnp.sum(acc * acc, axis=0, keepdims=True)
        if m1p != m1:
            acc = jnp.concatenate(
                [acc, jnp.zeros((m1p - m1, c2p), jnp.float32)], axis=0)
        y2_ref[...] = acc.astype(y2_ref.dtype)

    return kernel


def _bn_add_relu_kernel(y_ref, skip_ref, scale_ref, shift_ref, out_ref):
    """Pass 2, identity skip: bn2 + residual add + ReLU (all streams bf16 in)."""
    y = y_ref[...].astype(jnp.float32) * scale_ref[...] + shift_ref[...]
    out_ref[...] = jnp.maximum(y + skip_ref[...].astype(jnp.float32),
                               0.0).astype(out_ref.dtype)


def _bn_proj_add_relu_kernel(y_ref, skip_ref, w3_ref, b3_ref,
                             scale_ref, shift_ref, out_ref):
    """Pass 2, 1x1-conv skip: bn2 + (skip @ W3 + b3) + ReLU."""
    y = y_ref[...].astype(jnp.float32) * scale_ref[...] + shift_ref[...]
    proj = jnp.dot(skip_ref[...], w3_ref[...],
                   preferred_element_type=jnp.float32) + b3_ref[...]
    out_ref[...] = jnp.maximum(y + proj, 0.0).astype(out_ref.dtype)


# ---------------------------- pallas_call wrappers --------------------------- #

def _conv1_stats(xph, w, n, ho, wo, s, m1, m1p):
    p = s * s
    _, hph, wph, cinp = xph.shape
    coutp = w.shape[-1]
    kern = _make_conv1_kernel(ho, wo, s, m1, m1p, cinp, coutp)
    need = (2 * p * hph * wph * cinp * 4          # double-buffered input phases (f32)
            + 2 * 9 * cinp * coutp * 2            # resident bf16 weights
            + 2 * m1p * coutp * 2                 # double-buffered bf16 y tile
            + m1 * coutp * 4 + 8 * coutp * 4)     # accumulator + partials
    cost = pl.CostEstimate(
        flops=2 * n * m1 * 9 * cinp * coutp, transcendentals=0,
        bytes_accessed=int(xph.size * 4 + w.size * 2 + n * m1p * coutp * 2))
    return pl.pallas_call(
        kern,
        grid=(n,),
        in_specs=[
            pl.BlockSpec((p, hph, wph, cinp), lambda i: (i, 0, 0, 0)),
            pl.BlockSpec((9, cinp, coutp), lambda i: (0, 0, 0)),
        ],
        out_specs=[
            pl.BlockSpec((m1p, coutp), lambda i: (i, 0)),
            pl.BlockSpec((None, 1, coutp), lambda i: (i, 0, 0)),
            pl.BlockSpec((None, 1, coutp), lambda i: (i, 0, 0)),
        ],
        out_shape=[
            jax.ShapeDtypeStruct((n * m1p, coutp), jnp.bfloat16),
            jax.ShapeDtypeStruct((n, 1, coutp), jnp.float32),
            jax.ShapeDtypeStruct((n, 1, coutp), jnp.float32),
        ],
        compiler_params=pltpu.CompilerParams(
            dimension_semantics=("parallel",),
            vmem_limit_bytes=_vmem_limit(need)),
        cost_estimate=cost,
    )(xph, w)


def _bn_relu_conv2_stats(y1, scale1, shift1, w2, n, ho, wo, m1, m1p):
    c1p = y1.shape[-1]
    c2p = w2.shape[-1]
    kern = _make_bn_relu_conv2_kernel(ho, wo, m1, m1p, c1p, c2p)
    need = (2 * m1p * c1p * 2 + 2 * 9 * c1p * c2p * 2
            + (ho + 2) * (wo + 2) * c1p * 4
            + 2 * m1p * c2p * 2 + m1 * c2p * 4 + 8 * c2p * 4)
    cost = pl.CostEstimate(
        flops=2 * n * m1 * 9 * c1p * c2p, transcendentals=0,
        bytes_accessed=int(y1.size * 2 + w2.size * 2 + n * m1p * c2p * 2))
    return pl.pallas_call(
        kern,
        grid=(n,),
        in_specs=[
            pl.BlockSpec((m1p, c1p), lambda i: (i, 0)),
            pl.BlockSpec((1, c1p), lambda i: (0, 0)),
            pl.BlockSpec((1, c1p), lambda i: (0, 0)),
            pl.BlockSpec((9, c1p, c2p), lambda i: (0, 0, 0)),
        ],
        out_specs=[
            pl.BlockSpec((m1p, c2p), lambda i: (i, 0)),
            pl.BlockSpec((None, 1, c2p), lambda i: (i, 0, 0)),
            pl.BlockSpec((None, 1, c2p), lambda i: (i, 0, 0)),
        ],
        out_shape=[
            jax.ShapeDtypeStruct((n * m1p, c2p), jnp.bfloat16),
            jax.ShapeDtypeStruct((n, 1, c2p), jnp.float32),
            jax.ShapeDtypeStruct((n, 1, c2p), jnp.float32),
        ],
        scratch_shapes=[pltpu.VMEM((ho + 2, wo + 2, c1p), jnp.float32)],
        compiler_params=pltpu.CompilerParams(
            dimension_semantics=("parallel",),
            vmem_limit_bytes=_vmem_limit(need)),
        cost_estimate=cost,
    )(y1, scale1, shift1, w2)


def _bn_skip_relu(y2, skip, scale, shift, tm):
    mp, cp = y2.shape
    return pl.pallas_call(
        _bn_add_relu_kernel,
        grid=(mp // tm,),
        in_specs=[
            pl.BlockSpec((tm, cp), lambda i: (i, 0)),
            pl.BlockSpec((tm, cp), lambda i: (i, 0)),
            pl.BlockSpec((1, cp), lambda i: (0, 0)),
            pl.BlockSpec((1, cp), lambda i: (0, 0)),
        ],
        out_specs=pl.BlockSpec((tm, cp), lambda i: (i, 0)),
        out_shape=jax.ShapeDtypeStruct((mp, cp), jnp.float32),
        compiler_params=pltpu.CompilerParams(dimension_semantics=("parallel",)),
    )(y2, skip, scale, shift)


def _bn_proj_skip_relu(y2, skip, w3, b3, scale, shift, tm):
    mp, cp = y2.shape
    k3p = skip.shape[1]
    return pl.pallas_call(
        _bn_proj_add_relu_kernel,
        grid=(mp // tm,),
        in_specs=[
            pl.BlockSpec((tm, cp), lambda i: (i, 0)),
            pl.BlockSpec((tm, k3p), lambda i: (i, 0)),
            pl.BlockSpec((k3p, cp), lambda i: (0, 0)),
            pl.BlockSpec((1, cp), lambda i: (0, 0)),
            pl.BlockSpec((1, cp), lambda i: (0, 0)),
            pl.BlockSpec((1, cp), lambda i: (0, 0)),
        ],
        out_specs=pl.BlockSpec((tm, cp), lambda i: (i, 0)),
        out_shape=jax.ShapeDtypeStruct((mp, cp), jnp.float32),
        compiler_params=pltpu.CompilerParams(dimension_semantics=("parallel",)),
    )(y2, skip, w3, b3, scale, shift)


# ------------------------------ BN stat combine ------------------------------ #

def _bn_scale_shift(sums, ssqs, gamma, beta, count, cp):
    """Tiny cross-image combine -> per-channel affine (exact biased batch stats).
    Single-pass var = E[y^2] - E[y]^2 in f32 (see TODO at top for production scale)."""
    total = jnp.sum(sums[:, 0, :], axis=0)
    total_sq = jnp.sum(ssqs[:, 0, :], axis=0)
    mean = total / count
    var = jnp.maximum(total_sq / count - mean * mean, 0.0)
    g = _pad_to(gamma.reshape(-1), (cp,))
    b = _pad_to(beta.reshape(-1), (cp,))
    scale = g * lax.rsqrt(var + BN_EPS)
    shift = b - mean * scale
    return scale.reshape(1, cp), shift.reshape(1, cp)


# -------------------------------- forward pass -------------------------------- #

def residual_forward(x_nchw, params, use_1x1conv=False, strides=1):
    """Pallas implementation of Residual.forward. Input/output are NCHW like PyTorch."""
    x = jnp.transpose(x_nchw, (0, 2, 3, 1)).astype(jnp.float32)   # -> NHWC
    n, h, w, cin = x.shape
    cmid = params["w1"].shape[-1]
    s = strides
    ho = (h - 1) // s + 1
    wo = (w - 1) // s + 1
    m1 = ho * wo                       # output pixels per image
    m1p = _round_up(m1, SUBLANE)
    m = n * m1                         # total output pixels (BN statistic count)

    cin_p = _cpad(cin)
    c_p = _cpad(cmid)

    # ---- stride-phase-decomposed, channel-padded padded input (no HBM im2col) ----
    x_pad = _pad_to(jnp.pad(x, ((0, 0), (1, 1), (1, 1), (0, 0))),
                    (n, h + 2, w + 2, cin_p))
    hph, wph = 2 // s + ho, 2 // s + wo
    phases = []
    for ph in range(s):
        for pw in range(s):
            sub = x_pad[:, ph::s, pw::s, :][:, :hph, :wph, :]
            sub = jnp.pad(sub, ((0, 0), (0, hph - sub.shape[1]),
                                (0, wph - sub.shape[2]), (0, 0)))
            phases.append(sub)
    xph = jnp.stack(phases, axis=1).reshape(n * s * s, hph, wph, cin_p)

    # ---- conv1 (stride s; bias dropped: BN cancels it exactly) + bn1 partials ----
    w1 = _pad_to(params["w1"].reshape(9, cin, cmid),
                 (9, cin_p, c_p)).astype(jnp.bfloat16)
    y1, sum1, ssq1 = _conv1_stats(xph, w1, n, ho, wo, s, m1, m1p)
    scale1, shift1 = _bn_scale_shift(sum1, ssq1, params["g1"], params["beta1"], m, c_p)

    # ---- fused bn1 + relu -> conv2 (stride 1; bias dropped) + bn2 partials -------
    w2 = _pad_to(params["w2"].reshape(9, cmid, cmid),
                 (9, c_p, c_p)).astype(jnp.bfloat16)
    y2, sum2, ssq2 = _bn_relu_conv2_stats(y1, scale1, shift1, w2, n, ho, wo, m1, m1p)
    scale2, shift2 = _bn_scale_shift(sum2, ssq2, params["g2"], params["beta2"], m, c_p)

    # ---- pass 2: bn2 + residual (+ optional 1x1 projection) + relu ---------------
    mf = n * m1p
    tm, _, mfp = _pick_tiles(mf, ELEMWISE_TM_MAX)
    x_skip = x[:, ::s, ::s, :].reshape(n, m1, cin)
    if m1p != m1:
        x_skip = jnp.pad(x_skip, ((0, 0), (0, m1p - m1), (0, 0)))
    x_skip = x_skip.reshape(mf, cin)
    y2f = y2 if mfp == mf else jnp.pad(y2, ((0, mfp - mf), (0, 0)))

    if use_1x1conv:
        skip = _pad_to(x_skip, (mfp, cin_p)).astype(jnp.bfloat16)
        w3 = _pad_to(params["w3"], (cin_p, c_p)).astype(jnp.bfloat16)
        b3 = _pad_to(params["b3"].reshape(-1), (c_p,)).reshape(1, c_p)
        out2d = _bn_proj_skip_relu(y2f, skip, w3, b3, scale2, shift2, tm)
    else:
        # identity skip (PyTorch requires input_channels == num_channels here)
        skip = _pad_to(x_skip, (mfp, c_p)).astype(jnp.bfloat16)
        out2d = _bn_skip_relu(y2f, skip, scale2, shift2, tm)

    out = out2d[:mf].reshape(n, m1p, c_p)[:, :m1, :cmid].reshape(n, ho, wo, cmid)
    return jnp.transpose(out, (0, 3, 1, 2))                        # -> NCHW


# ----------------------- pure-JAX reference (checking) ------------------------ #

def residual_reference(x_nchw, params, use_1x1conv=False, strides=1):
    x = jnp.transpose(x_nchw, (0, 2, 3, 1)).astype(jnp.float32)

    def conv3x3(inp, wgt, bias, s):
        y = lax.conv_general_dilated(
            inp, wgt, (s, s), ((1, 1), (1, 1)),
            dimension_numbers=("NHWC", "HWIO", "NHWC"))
        return y + bias.reshape(1, 1, 1, -1)

    def bn(y, g, be):
        mean = jnp.mean(y, axis=(0, 1, 2), keepdims=True)
        var = jnp.mean((y - mean) ** 2, axis=(0, 1, 2), keepdims=True)
        return (y - mean) * lax.rsqrt(var + BN_EPS) * g.reshape(1, 1, 1, -1) \
            + be.reshape(1, 1, 1, -1)

    y = jax.nn.relu(bn(conv3x3(x, params["w1"], params["b1"], strides),
                       params["g1"], params["beta1"]))
    y = bn(conv3x3(y, params["w2"], params["b2"], 1), params["g2"], params["beta2"])
    skip = x[:, ::strides, ::strides, :]
    if use_1x1conv:
        skip = jnp.einsum("nhwc,cd->nhwd", skip, params["w3"]) \
            + params["b3"].reshape(1, 1, 1, -1)
    y = jax.nn.relu(y + skip)
    return jnp.transpose(y, (0, 3, 1, 2))


# ----------------------------------- main -------------------------------------- #

def init_params(key, input_channels, num_channels, use_1x1conv):
    ks = jax.random.split(key, 6)
    params = {
        "w1": 0.1 * jax.random.normal(ks[0], (3, 3, input_channels, num_channels), jnp.float32),
        "b1": 0.05 * jax.random.normal(ks[1], (1, num_channels), jnp.float32),
        "w2": 0.1 * jax.random.normal(ks[2], (3, 3, num_channels, num_channels), jnp.float32),
        "b2": 0.05 * jax.random.normal(ks[3], (1, num_channels), jnp.float32),
        "g1": jnp.ones((1, num_channels), jnp.float32),
        "beta1": jnp.zeros((1, num_channels), jnp.float32),
        "g2": jnp.ones((1, num_channels), jnp.float32),
        "beta2": jnp.zeros((1, num_channels), jnp.float32),
    }
    if use_1x1conv:
        params["w3"] = 0.1 * jax.random.normal(ks[4], (input_channels, num_channels), jnp.float32)
        params["b3"] = 0.05 * jax.random.normal(ks[5], (1, num_channels), jnp.float32)
    return params


def _run_case(key, n, cin, cout, h, w, use_1x1, strides):
    kx, kp = jax.random.split(key)
    x = jax.random.normal(kx, (n, cin, h, w), jnp.float32)       # NCHW like PyTorch
    params = init_params(kp, cin, cout, use_1x1)

    out = jax.block_until_ready(residual_forward(x, params, use_1x1, strides))
    ref = jax.block_until_ready(residual_reference(x, params, use_1x1, strides))

    ho = (h - 1) // strides + 1
    wo = (w - 1) // strides + 1
    assert out.shape == (n, cout, ho, wo), out.shape
    # bf16 MXU operands / bf16 y1,y2,skip HBM streams (f32 accumulate + f32 BN math)
    err = float(jnp.max(jnp.abs(out - ref)))
    assert jnp.allclose(out, ref, atol=5e-2, rtol=5e-2), f"max err {err}"


if __name__ == "__main__":
    key = jax.random.PRNGKey(0)
    k1, k2 = jax.random.split(key)
    # Residual(8, 8, use_1x1conv=False, strides=1) on x: (2, 8, 16, 16)
    _run_case(k1, n=2, cin=8, cout=8, h=16, w=16, use_1x1=False, strides=1)
    # Residual(8, 16, use_1x1conv=True, strides=2) on x: (2, 8, 16, 16)
    _run_case(k2, n=2, cin=8, cout=16, h=16, w=16, use_1x1=True, strides=2)
    print("KERNEL_OK")
</pallas_src>

<mosaic_0001>
module attributes {stable_mosaic.version = 11 : i64} {
  func.func @kernel(%arg0: i32, %arg1: memref<1x18x18x128xf32, #tpu.memory_space<vmem>>, %arg2: memref<9x128x128xbf16, #tpu.memory_space<vmem>>, %arg3: memref<256x128xbf16, #tpu.memory_space<vmem>>, %arg4: memref<1x1x128xf32, #tpu.memory_space<vmem>>, %arg5: memref<1x1x128xf32, #tpu.memory_space<vmem>>) attributes {dimension_semantics = [#tpu.dimension_semantics<parallel>], iteration_bounds = array<i64: 2>, scalar_prefetch = 0 : i64, scratch_operands = 0 : i64, tpu.core_type = #tpu.core_type<tc>, window_params = [{transform_indices = @transform_0, window_bounds = array<i64: 1, 18, 18, 128>}, {pipeline_mode = #tpu.pipeline_mode<synchronous>, transform_indices = @transform_1, window_bounds = array<i64: 9, 128, 128>}, {transform_indices = @transform_2, window_bounds = array<i64: 256, 128>}, {transform_indices = @transform_3, window_bounds = array<i64: 1, 1, 128>}, {transform_indices = @transform_4, window_bounds = array<i64: 1, 1, 128>}]} {
    %cst = arith.constant 0.000000e+00 : f32
    %0 = vector.broadcast %cst : f32 to vector<256x128xf32>
    %c0 = arith.constant 0 : index
    %c0_0 = arith.constant 0 : index
    %c0_1 = arith.constant 0 : index
    %c0_2 = arith.constant 0 : index
    %1 = vector.load %arg1[%c0, %c0_0, %c0_1, %c0_2] : memref<1x18x18x128xf32, #tpu.memory_space<vmem>>, vector<1x16x16x128xf32>
    %2 = vector.shape_cast %1 : vector<1x16x16x128xf32> to vector<16x16x128xf32>
    %3 = vector.shape_cast %2 : vector<16x16x128xf32> to vector<256x128xf32>
    %4 = arith.truncf %3 : vector<256x128xf32> to vector<256x128xbf16>
    %c0_3 = arith.constant 0 : index
    %c0_4 = arith.constant 0 : index
    %c0_5 = arith.constant 0 : index
    %5 = vector.load %arg2[%c0_3, %c0_4, %c0_5] : memref<9x128x128xbf16, #tpu.memory_space<vmem>>, vector<1x128x128xbf16>
    %6 = vector.shape_cast %5 : vector<1x128x128xbf16> to vector<128x128xbf16>
    %cst_6 = arith.constant dense<0.000000e+00> : vector<256x128xf32>
    %7 = tpu.matmul %4, %6, %cst_6 {dimension_numbers = #tpu.dot_dimension_numbers<[1], [0], [0], [1], [0, 0, 1, 1], [], []>} : vector<256x128xbf16>, vector<128x128xbf16>, vector<256x128xf32> -> vector<256x128xf32>
    %8 = arith.addf %0, %7 : vector<256x128xf32>
    %c0_7 = arith.constant 0 : index
    %c0_8 = arith.constant 0 : index
    %c1 = arith.constant 1 : index
    %c0_9 = arith.constant 0 : index
    %9 = vector.load %arg1[%c0_7, %c0_8, %c1, %c0_9] : memref<1x18x18x128xf32, #tpu.memory_space<vmem>>, vector<1x16x16x128xf32>
    %10 = vector.shape_cast %9 : vector<1x16x16x128xf32> to vector<16x16x128xf32>
    %11 = vector.shape_cast %10 : vector<16x16x128xf32> to vector<256x128xf32>
    %12 = arith.truncf %11 : vector<256x128xf32> to vector<256x128xbf16>
    %c1_10 = arith.constant 1 : index
    %c0_11 = arith.constant 0 : index
    %c0_12 = arith.constant 0 : index
    %13 = vector.load %arg2[%c1_10, %c0_11, %c0_12] : memref<9x128x128xbf16, #tpu.memory_space<vmem>>, vector<1x128x128xbf16>
    %14 = vector.shape_cast %13 : vector<1x128x128xbf16> to vector<128x128xbf16>
    %cst_13 = arith.constant dense<0.000000e+00> : vector<256x128xf32>
    %15 = tpu.matmul %12, %14, %cst_13 {dimension_numbers = #tpu.dot_dimension_numbers<[1], [0], [0], [1], [0, 0, 1, 1], [], []>} : vector<256x128xbf16>, vector<128x128xbf16>, vector<256x128xf32> -> vector<256x128xf32>
    %16 = arith.addf %8, %15 : vector<256x128xf32>
    %c0_14 = arith.constant 0 : index
    %c0_15 = arith.constant 0 : index
    %c2 = arith.constant 2 : index
    %c0_16 = arith.constant 0 : index
    %17 = vector.load %arg1[%c0_14, %c0_15, %c2, %c0_16] : memref<1x18x18x128xf32, #tpu.memory_space<vmem>>, vector<1x16x16x128xf32>
    %18 = vector.shape_cast %17 : vector<1x16x16x128xf32> to vector<16x16x128xf32>
    %19 = vector.shape_cast %18 : vector<16x16x128xf32> to vector<256x128xf32>
    %20 = arith.truncf %19 : vector<256x128xf32> to vector<256x128xbf16>
    %c2_17 = arith.constant 2 : index
    %c0_18 = arith.constant 0 : index
    %c0_19 = arith.constant 0 : index
    %21 = vector.load %arg2[%c2_17, %c0_18, %c0_19] : memref<9x128x128xbf16, #tpu.memory_space<vmem>>, vector<1x128x128xbf16>
    %22 = vector.shape_cast %21 : vector<1x128x128xbf16> to vector<128x128xbf16>
    %cst_20 = arith.constant dense<0.000000e+00> : vector<256x128xf32>
    %23 = tpu.matmul %20, %22, %cst_20 {dimension_numbers = #tpu.dot_dimension_numbers<[1], [0], [0], [1], [0, 0, 1, 1], [], []>} : vector<256x128xbf16>, vector<128x128xbf16>, vector<256x128xf32> -> vector<256x128xf32>
    %24 = arith.addf %16, %23 : vector<256x128xf32>
    %c0_21 = arith.constant 0 : index
    %c1_22 = arith.constant 1 : index
    %c0_23 = arith.constant 0 : index
    %c0_24 = arith.constant 0 : index
    %25 = vector.load %arg1[%c0_21, %c1_22, %c0_23, %c0_24] : memref<1x18x18x128xf32, #tpu.memory_space<vmem>>, vector<1x16x16x128xf32>
    %26 = vector.shape_cast %25 : vector<1x16x16x128xf32> to vector<16x16x128xf32>
    %27 = vector.shape_cast %26 : vector<16x16x128xf32> to vector<256x128xf32>
    %28 = arith.truncf %27 : vector<256x128xf32> to vector<256x128xbf16>
    %c3 = arith.constant 3 : index
    %c0_25 = arith.constant 0 : index
    %c0_26 = arith.constant 0 : index
    %29 = vector.load %arg2[%c3, %c0_25, %c0_26] : memref<9x128x128xbf16, #tpu.memory_space<vmem>>, vector<1x128x128xbf16>
    %30 = vector.shape_cast %29 : vector<1x128x128xbf16> to vector<128x128xbf16>
    %cst_27 = arith.constant dense<0.000000e+00> : vector<256x128xf32>
    %31 = tpu.matmul %28, %30, %cst_27 {dimension_numbers = #tpu.dot_dimension_numbers<[1], [0], [0], [1], [0, 0, 1, 1], [], []>} : vector<256x128xbf16>, vector<128x128xbf16>, vector<256x128xf32> -> vector<256x128xf32>
    %32 = arith.addf %24, %31 : vector<256x128xf32>
    %c0_28 = arith.constant 0 : index
    %c1_29 = arith.constant 1 : index
    %c1_30 = arith.constant 1 : index
    %c0_31 = arith.constant 0 : index
    %33 = vector.load %arg1[%c0_28, %c1_29, %c1_30, %c0_31] : memref<1x18x18x128xf32, #tpu.memory_space<vmem>>, vector<1x16x16x128xf32>
    %34 = vector.shape_cast %33 : vector<1x16x16x128xf32> to vector<16x16x128xf32>
    %35 = vector.shape_cast %34 : vector<16x16x128xf32> to vector<256x128xf32>
    %36 = arith.truncf %35 : vector<256x128xf32> to vector<256x128xbf16>
    %c4 = arith.constant 4 : index
    %c0_32 = arith.constant 0 : index
    %c0_33 = arith.constant 0 : index
    %37 = vector.load %arg2[%c4, %c0_32, %c0_33] : memref<9x128x128xbf16, #tpu.memory_space<vmem>>, vector<1x128x128xbf16>
    %38 = vector.shape_cast %37 : vector<1x128x128xbf16> to vector<128x128xbf16>
    %cst_34 = arith.constant dense<0.000000e+00> : vector<256x128xf32>
    %39 = tpu.matmul %36, %38, %cst_34 {dimension_numbers = #tpu.dot_dimension_numbers<[1], [0], [0], [1], [0, 0, 1, 1], [], []>} : vector<256x128xbf16>, vector<128x128xbf16>, vector<256x128xf32> -> vector<256x128xf32>
    %40 = arith.addf %32, %39 : vector<256x128xf32>
    %c0_35 = arith.constant 0 : index
    %c1_36 = arith.constant 1 : index
    %c2_37 = arith.constant 2 : index
    %c0_38 = arith.constant 0 : index
    %41 = vector.load %arg1[%c0_35, %c1_36, %c2_37, %c0_38] : memref<1x18x18x128xf32, #tpu.memory_space<vmem>>, vector<1x16x16x128xf32>
    %42 = vector.shape_cast %41 : vector<1x16x16x128xf32> to vector<16x16x128xf32>
    %43 = vector.shape_cast %42 : vector<16x16x128xf32> to vector<256x128xf32>
    %44 = arith.truncf %43 : vector<256x128xf32> to vector<256x128xbf16>
    %c5 = arith.constant 5 : index
    %c0_39 = arith.constant 0 : index
    %c0_40 = arith.constant 0 : index
    %45 = vector.load %arg2[%c5, %c0_39, %c0_40] : memref<9x128x128xbf16, #tpu.memory_space<vmem>>, vector<1x128x128xbf16>
    %46 = vector.shape_cast %45 : vector<1x128x128xbf16> to vector<128x128xbf16>
    %cst_41 = arith.constant dense<0.000000e+00> : vector<256x128xf32>
    %47 = tpu.matmul %44, %46, %cst_41 {dimension_numbers = #tpu.dot_dimension_numbers<[1], [0], [0], [1], [0, 0, 1, 1], [], []>} : vector<256x128xbf16>, vector<128x128xbf16>, vector<256x128xf32> -> vector<256x128xf32>
    %48 = arith.addf %40, %47 : vector<256x128xf32>
    %c0_42 = arith.constant 0 : index
    %c2_43 = arith.constant 2 : index
    %c0_44 = arith.constant 0 : index
    %c0_45 = arith.constant 0 : index
    %49 = vector.load %arg1[%c0_42, %c2_43, %c0_44, %c0_45] : memref<1x18x18x128xf32, #tpu.memory_space<vmem>>, vector<1x16x16x128xf32>
    %50 = vector.shape_cast %49 : vector<1x16x16x128xf32> to vector<16x16x128xf32>
    %51 = vector.shape_cast %50 : vector<16x16x128xf32> to vector<256x128xf32>
    %52 = arith.truncf %51 : vector<256x128xf32> to vector<256x128xbf16>
    %c6 = arith.constant 6 : index
    %c0_46 = arith.constant 0 : index
    %c0_47 = arith.constant 0 : index
    %53 = vector.load %arg2[%c6, %c0_46, %c0_47] : memref<9x128x128xbf16, #tpu.memory_space<vmem>>, vector<1x128x128xbf16>
    %54 = vector.shape_cast %53 : vector<1x128x128xbf16> to vector<128x128xbf16>
    %cst_48 = arith.constant dense<0.000000e+00> : vector<256x128xf32>
    %55 = tpu.matmul %52, %54, %cst_48 {dimension_numbers = #tpu.dot_dimension_numbers<[1], [0], [0], [1], [0, 0, 1, 1], [], []>} : vector<256x128xbf16>, vector<128x128xbf16>, vector<256x128xf32> -> vector<256x128xf32>
    %56 = arith.addf %48, %55 : vector<256x128xf32>
    %c0_49 = arith.constant 0 : index
    %c2_50 = arith.constant 2 : index
    %c1_51 = arith.constant 1 : index
    %c0_52 = arith.constant 0 : index
    %57 = vector.load %arg1[%c0_49, %c2_50, %c1_51, %c0_52] : memref<1x18x18x128xf32, #tpu.memory_space<vmem>>, vector<1x16x16x128xf32>
    %58 = vector.shape_cast %57 : vector<1x16x16x128xf32> to vector<16x16x128xf32>
    %59 = vector.shape_cast %58 : vector<16x16x128xf32> to vector<256x128xf32>
    %60 = arith.truncf %59 : vector<256x128xf32> to vector<256x128xbf16>
    %c7 = arith.constant 7 : index
    %c0_53 = arith.constant 0 : index
    %c0_54 = arith.constant 0 : index
    %61 = vector.load %arg2[%c7, %c0_53, %c0_54] : memref<9x128x128xbf16, #tpu.memory_space<vmem>>, vector<1x128x128xbf16>
    %62 = vector.shape_cast %61 : vector<1x128x128xbf16> to vector<128x128xbf16>
    %cst_55 = arith.constant dense<0.000000e+00> : vector<256x128xf32>
    %63 = tpu.matmul %60, %62, %cst_55 {dimension_numbers = #tpu.dot_dimension_numbers<[1], [0], [0], [1], [0, 0, 1, 1], [], []>} : vector<256x128xbf16>, vector<128x128xbf16>, vector<256x128xf32> -> vector<256x128xf32>
    %64 = arith.addf %56, %63 : vector<256x128xf32>
    %c0_56 = arith.constant 0 : index
    %c2_57 = arith.constant 2 : index
    %c2_58 = arith.constant 2 : index
    %c0_59 = arith.constant 0 : index
    %65 = vector.load %arg1[%c0_56, %c2_57, %c2_58, %c0_59] : memref<1x18x18x128xf32, #tpu.memory_space<vmem>>, vector<1x16x16x128xf32>
    %66 = vector.shape_cast %65 : vector<1x16x16x128xf32> to vector<16x16x128xf32>
    %67 = vector.shape_cast %66 : vector<16x16x128xf32> to vector<256x128xf32>
    %68 = arith.truncf %67 : vector<256x128xf32> to vector<256x128xbf16>
    %c8 = arith.constant 8 : index
    %c0_60 = arith.constant 0 : index
    %c0_61 = arith.constant 0 : index
    %69 = vector.load %arg2[%c8, %c0_60, %c0_61] : memref<9x128x128xbf16, #tpu.memory_space<vmem>>, vector<1x128x128xbf16>
    %70 = vector.shape_cast %69 : vector<1x128x128xbf16> to vector<128x128xbf16>
    %cst_62 = arith.constant dense<0.000000e+00> : vector<256x128xf32>
    %71 = tpu.matmul %68, %70, %cst_62 {dimension_numbers = #tpu.dot_dimension_numbers<[1], [0], [0], [1], [0, 0, 1, 1], [], []>} : vector<256x128xbf16>, vector<128x128xbf16>, vector<256x128xf32> -> vector<256x128xf32>
    %72 = arith.addf %64, %71 : vector<256x128xf32>
    %cst_63 = arith.constant dense<0.000000e+00> : vector<128xf32>
    %73 = vector.multi_reduction <add>, %72, %cst_63 [0] : vector<256x128xf32> to vector<128xf32>
    %74 = vector.shape_cast %73 : vector<128xf32> to vector<1x128xf32>
    %c0_64 = arith.constant 0 : index
    %c0_65 = arith.constant 0 : index
    %c0_66 = arith.constant 0 : index
    %75 = vector.load %arg4[%c0_64, %c0_65, %c0_66] : memref<1x1x128xf32, #tpu.memory_space<vmem>>, vector<1x1x128xf32>
    %76 = vector.shape_cast %75 : vector<1x1x128xf32> to vector<1x128xf32>
    %77 = vector.shape_cast %74 : vector<1x128xf32> to vector<1x1x128xf32>
    tpu.vector_store %arg4[%c0_64, %c0_65, %c0_66], %77 {strides = array<i32>} : memref<1x1x128xf32, #tpu.memory_space<vmem>>, vector<1x1x128xf32>,
    %78 = arith.mulf %72, %72 : vector<256x128xf32>
    %cst_67 = arith.constant dense<0.000000e+00> : vector<128xf32>
    %79 = vector.multi_reduction <add>, %78, %cst_67 [0] : vector<256x128xf32> to vector<128xf32>
    %80 = vector.shape_cast %79 : vector<128xf32> to vector<1x128xf32>
    %c0_68 = arith.constant 0 : index
    %c0_69 = arith.constant 0 : index
    %c0_70 = arith.constant 0 : index
    %81 = vector.load %arg5[%c0_68, %c0_69, %c0_70] : memref<1x1x128xf32, #tpu.memory_space<vmem>>, vector<1x1x128xf32>
    %82 = vector.shape_cast %81 : vector<1x1x128xf32> to vector<1x128xf32>
    %83 = vector.shape_cast %80 : vector<1x128xf32> to vector<1x1x128xf32>
    tpu.vector_store %arg5[%c0_68, %c0_69, %c0_70], %83 {strides = array<i32>} : memref<1x1x128xf32, #tpu.memory_space<vmem>>, vector<1x1x128xf32>,
    %84 = arith.truncf %72 : vector<256x128xf32> to vector<256x128xbf16>
    %c0_71 = arith.constant 0 : index
    %c0_72 = arith.constant 0 : index
    %85 = vector.load %arg3[%c0_71, %c0_72] : memref<256x128xbf16, #tpu.memory_space<vmem>>, vector<256x128xbf16>
    tpu.vector_store %arg3[%c0_71, %c0_72], %84 {strides = array<i32>} : memref<256x128xbf16, #tpu.memory_space<vmem>>, vector<256x128xbf16>,
    return
  }
  func.func @transform_0(%arg0: i32) -> (i32, i32, i32, i32) {
    %c0_i32 = arith.constant 0 : i32
    %c0_i32_0 = arith.constant 0 : i32
    %c0_i32_1 = arith.constant 0 : i32
    %c0_i32_2 = arith.constant 0 : i32
    return %arg0, %c0_i32, %c0_i32_0, %c0_i32_1 : i32, i32, i32, i32
  }
  func.func @transform_1(%arg0: i32) -> (i32, i32, i32) {
    %c0_i32 = arith.constant 0 : i32
    %c0_i32_0 = arith.constant 0 : i32
    %c0_i32_1 = arith.constant 0 : i32
    %c0_i32_2 = arith.constant 0 : i32
    return %c0_i32, %c0_i32_0, %c0_i32_1 : i32, i32, i32
  }
  func.func @transform_2(%arg0: i32) -> (i32, i32) {
    %c0_i32 = arith.constant 0 : i32
    %c0_i32_0 = arith.constant 0 : i32
    return %arg0, %c0_i32 : i32, i32
  }
  func.func @transform_3(%arg0: i32) -> (i32, i32, i32) {
    %c0_i32 = arith.constant 0 : i32
    %c0_i32_0 = arith.constant 0 : i32
    %c0_i32_1 = arith.constant 0 : i32
    return %arg0, %c0_i32, %c0_i32_0 : i32, i32, i32
  }
  func.func @transform_4(%arg0: i32) -> (i32, i32, i32) {
    %c0_i32 = arith.constant 0 : i32
    %c0_i32_0 = arith.constant 0 : i32
    %c0_i32_1 = arith.constant 0 : i32
    return %arg0, %c0_i32, %c0_i32_0 : i32, i32, i32
  }
}

</mosaic_0001>

<bundles_post_ra>
// kernel: tpu_custom_call.1
= control target key start
LH: loop header
LB: loop body
LE: loop exit
PB: predicated region body
PF: predicated region fallthrough
CT: control target
= control target key end

     0   :  { %10 = vsyncpa [#allocation3], 0  ;;  %s5912_s0 = inlined_call_operand.vmem [shape: f32[2,18,18,128], index: 0, kind: input, shape index: {}]   ;;  %s5913_s1 = inlined_call_operand.vmem [shape: bf16[9,128,128], index: 1, kind: input, shape index: {}]   ;;  %s5914_s2 = inlined_call_operand.hbm [shape: bf16[512,128], index: 2, kind: output, shape index: {0}]   ;;  %s5915_s3 = inlined_call_operand.hbm [shape: f32[2,1,128], index: 3, kind: output, shape index: {1}]   ;;  %s5916_s4 = inlined_call_operand.hbm [shape: f32[2,1,128], index: 4, kind: output, shape index: {2}]  }
   0x1   :  { %12 = vsyncpa [#allocation3 + $0x1], 0 }
   0x2   :  { %13 = vsyncpa [#allocation5], 0 }
   0x3   :  { %15 = vsyncpa [#allocation5 + $0x1], 0  ;;  %s5107_s15 = smov 0   ;;  %s5109_s16 = smov 0  }
   0x4   :  { %s5111_s17 = smov 0   ;;  %s5113_s18 = smov 0  }
   0x5 LB: > { %s5128_s19 = sadd.s32 4294967295, %s5075_s18   ;;  %s3336_s20 = sadd.s32 4294967294, %s5075_s18   ;;  %s5075_s18 = sphi %s5113_s18, %s5922_s18   ;;  %s5071_s17 = sphi %s5111_s17, %s5921_s17   ;;  %s5067_s16 = sphi %s5109_s16, %s5920_s16   ;;  %s5063_s15 = sphi %s5107_s15, %s5919_s15  }
   0x6   : > { %s5132_s21 = sadd.s32 1, %s5075_s18   ;;  %s75_s22 = sadd.s32 1, %s5071_s17 }
   0x7   : > { %s72_s23 = ssub.s32 %s5075_s18, %s5132_s21  ;;  %p85_p0 = scmp.ne.s32.totalorder %s5071_s17, %s5067_s16 }
   0x8   : > { %p73_p1 = scmp.eq.s32.totalorder %s72_s23, 0  ;;  %p86_p2 = scmp.eq.s32.totalorder %s5128_s19, 1 }
   0x9   : > { %p91_p3 = scmp.ne.s32.totalorder %s5067_s16, %s5063_s15  ;;  %p92_p4 = scmp.eq.s32.totalorder %s3336_s20, 1 }
   0xa   : > { %s5145_s24 = scalar_select %p73_p1, %s5071_s17, %s75_s22  }
   0xb   : > { %p5147_p5 = por %p86_p2, %p85_p0  ;;  %p5151_p6 = por %p92_p4, %p91_p3 }
   0xc   : > { %p3339_p7 = scmp.ge.s32.totalorder %s5075_s18, 1  ;;  %p173_p8 = scmp.lt.s32.totalorder %s5075_s18, 3 }
   0xe   : > { %p174_p9 = pnand %p3339_p7, %p173_p8 }
   0xf   : > { %v4873_v0 = vld [vmem:[%s5913_s1 + $0x40] sm:$0xff] (!%p174_p9)   ;;  %p207_p10 = scmp.lt.s32.totalorder (!%p174_p9), %s5128_s19, 1  ;;  %v4875_v2 = vld [vmem:[%s5913_s1 + $0x48] sm:$0xff] (!%p174_p9)   ;;  %v4877_v4 = vld [vmem:[%s5913_s1 + $0x50] sm:$0xff] (!%p174_p9)   ;;  %s3805_s27 = sshll.u32 (!%p174_p9), %s5128_s19, 11 }
  0x10   : > { %177 = sbr.rel (%p174_p9) target bundleno = 612 (0x264), region = 28  ;;  %v4874_v1 = vld [vmem:[%s5913_s1 + $0x100] sm:$0xff] (!%p174_p9)   ;;  %4117 = vmatprep.subr.bf16.mxu1 (!%p174_p9), %v4873_v0  ;;  %v4876_v3 = vld [vmem:[%s5913_s1 + $0x108] sm:$0xff] (!%p174_p9)   ;;  %v4878_v5 = vld [vmem:[%s5913_s1 + $0x110] sm:$0xff] (!%p174_p9)   ;;  %s5795_s5 = scalar_lea.hbm (!%p174_p9), %s5914_s2, %s3805_s27 }
  0x11   : > { %4309 = vmatprep.subr.bf16.mxu0 (!%p174_p9), %v4874_v1  ;;  %4118 = vmatpush3.bf16.msra.mxu1 (!%p174_p9), %v4873_v0  ;;  %v4879_v6 = vld [vmem:[%s5913_s1 + $0x58] sm:$0xff] (!%p174_p9)   ;;  %v4881_v8 = vld [vmem:[%s5913_s1 + $0x60] sm:$0xff] (!%p174_p9)   ;;  %v4883_v10 = vld [vmem:[%s5913_s1 + $0x68] sm:$0xff] (!%p174_p9)   ;;  %s5077_s8 = smov (!%p174_p9), [#allocation2]  }
  0x12   : > { %4310 = vmatpush3.bf16.msra.mxu0 (!%p174_p9), %v4874_v1  ;;  %4119 = vmatprep.subr.bf16.mxu1 (!%p174_p9), %v4875_v2  ;;  %v4880_v7 = vld [vmem:[%s5913_s1 + $0x118] sm:$0xff] (!%p174_p9)   ;;  %v4882_v9 = vld [vmem:[%s5913_s1 + $0x120] sm:$0xff] (!%p174_p9)   ;;  %v4884_v11 = vld [vmem:[%s5913_s1 + $0x128] sm:$0xff] (!%p174_p9)   ;;  %s4957_s10 = sshll.u32 (!%p174_p9), %s5077_s8, 4  ;;  %s4958_s10 = int_to_ptr.vmem [resolvable:$false] %s4957_s10 }
  0x13   : > { %4311 = vmatprep.subr.bf16.mxu0 (!%p174_p9), %v4876_v3  ;;  %v4885_v18 = vld [vmem:[%s5913_s1 + $0x70] sm:$0xff] (!%p174_p9)   ;;  %v4887_v20 = vld [vmem:[%s5913_s1 + $0x78] sm:$0xff] (!%p174_p9)   ;;  %v4889_v22 = vld [vmem:[%s5913_s1] sm:$0xff] (!%p174_p9)   ;;  %s4959_s11 = scalar_lea.vmem (!%p174_p9), %s4958_s10, 4096 }
  0x14   : > { %v4886_v19 = vld [vmem:[%s5913_s1 + $0x130] sm:$0xff] (!%p174_p9)   ;;  %v4888_v21 = vld [vmem:[%s5913_s1 + $0x138] sm:$0xff] (!%p174_p9)   ;;  %v4890_v25 = vld [vmem:[%s5913_s1 + $0x140] sm:$0xff] (!%p174_p9)  }
  0x15   : > { %4120 = vmatpush3.bf16.msra.mxu1 (!%p174_p9), %v4875_v2  ;;  %v4891_v29 = vld [vmem:[%s5913_s1 + $0x148] sm:$0xff] (!%p174_p9)   ;;  %v4893_v34 = vld [vmem:[%s5913_s1 + $0x150] sm:$0xff] (!%p174_p9)   ;;  %v4894_v40 = vld [vmem:[%s5913_s1 + $0x158] sm:$0xff] (!%p174_p9)  }
  0x16   : > { %4312 = vmatpush3.bf16.msra.mxu0 (!%p174_p9), %v4876_v3  ;;  %4121 = vmatprep.subr.bf16.mxu1 (!%p174_p9), %v4877_v4  ;;  %v4892_v31 = vld [vmem:[%s5913_s1 + $0x8] sm:$0xff] (!%p174_p9)   ;;  %v4895_v36 = vld [vmem:[%s5913_s1 + $0x10] sm:$0xff] (!%p174_p9)   ;;  %v4898_v41 = vld [vmem:[%s5913_s1 + $0x18] sm:$0xff] (!%p174_p9)  }
  0x17   : > { %s208_s13 = scalar_select %p207_p10, %s5128_s19, 1  ;;  %4313 = vmatprep.subr.bf16.mxu0 %v4878_v5  ;;  %v4896_v44 = vld [vmem:[%s5913_s1 + $0x160] sm:$0xff]   ;;  %v4897_v50 = vld [vmem:[%s5913_s1 + $0x168] sm:$0xff]   ;;  %v4899_v54 = vld [vmem:[%s5913_s1 + $0x170] sm:$0xff]  }
  0x18   : > { %v4901_v47 = vld [vmem:[%s5913_s1 + $0x20] sm:$0xff]   ;;  %v4903_v51 = vld [vmem:[%s5913_s1 + $0x28] sm:$0xff]   ;;  %v4905_v57 = vld [vmem:[%s5913_s1 + $0x30] sm:$0xff]  }
  0x19   : > { %s4821_s28 = smul.u32 432, %s208_s13  ;;  %4122 = vmatpush3.bf16.msra.mxu1 %v4877_v4  ;;  %v4900_v60 = vld [vmem:[%s5913_s1 + $0x178] sm:$0xff]   ;;  %v4902_v4 = vld [vmem:[%s5913_s1 + $0x180] sm:$0xff]  }
  0x1a   : > { %4314 = vmatpush3.bf16.msra.mxu0 %v4878_v5  ;;  %4123 = vmatprep.subr.bf16.mxu1 %v4879_v6  ;;  %v4907_v0 = vld [vmem:[%s5913_s1 + $0x38] sm:$0xff]  }
  0x1b   : > { %4315 = vmatprep.subr.bf16.mxu0 %v4880_v7  ;;  %s5192_s9 = scalar_lea.vmem %s5912_s0, %s4821_s28 }
  0x1c   : > { %v278_v12 = vld [vmem:[%s5192_s9 + $0x1] sm:$0xff]  ;;  %v279_v13 = vld [vmem:[%s5192_s9 + $0x9] sm:$0xff]  ;;  %v3454_v14 = vld [vmem:[%s5192_s9 + $0x19] sm:$0xff] }
  0x1d   : > { %4124 = vmatpush3.bf16.msra.mxu1 %v4879_v6  ;;  %v310_v15 = vpack.c.bf16 %v279_v13, %v278_v12  ;;  %v3455_v16 = vld [vmem:[%s5192_s9 + $0x21] sm:$0xff]  ;;  %v3456_v23 = vld [vmem:[%s5192_s9 + $0x31] sm:$0xff]  ;;  %v3457_v24 = vld [vmem:[%s5192_s9 + $0x39] sm:$0xff] }
  0x1e   : > { %4316 = vmatpush3.bf16.msra.mxu0 %v4880_v7  ;;  %4125 = vmatprep.subr.bf16.mxu1 %v4881_v8  ;;  %v1406_v17 = vpack.c.bf16 %v3455_v16, %v3454_v14  ;;  %v3458_v26 = vld [vmem:[%s5192_s9 + $0x49] sm:$0xff]  ;;  %v3459_v27 = vld [vmem:[%s5192_s9 + $0x51] sm:$0xff]  ;;  %v1407_v28 = vpack.c.bf16 %v3457_v24, %v3456_v23  ;;  %v3460_v32 = vld [vmem:[%s5192_s9 + $0x61] sm:$0xff] }
  0x1f   : > { %4317 = vmatprep.subr.bf16.mxu0 %v4882_v9  ;;  %4133 = vmatprep.mubr.bf16.mxu1 %v310_v15  ;;  %v1408_v30 = vpack.c.bf16 %v3459_v27, %v3458_v26  ;;  %v3461_v33 = vld [vmem:[%s5192_s9 + $0x69] sm:$0xff]  ;;  %v3462_v35 = vld [vmem:[%s5192_s9 + $0x79] sm:$0xff]  ;;  %v3463_v37 = vld [vmem:[%s5192_s9 + $0x81] sm:$0xff] }
  0x20   : > { %4325 = vmatprep.mubr.bf16.mxu0 %v1406_v17  ;;  %v1409_v38 = vpack.c.bf16 %v3461_v33, %v3460_v32  ;;  %v1410_v39 = vpack.c.bf16 %v3463_v37, %v3462_v35  ;;  %v3464_v42 = vld [vmem:[%s5192_s9 + $0x91] sm:$0xff]  ;;  %v3465_v43 = vld [vmem:[%s5192_s9 + $0x99] sm:$0xff]  ;;  %v3466_v45 = vld [vmem:[%s5192_s9 + $0xa9] sm:$0xff] }
  0x21   : > { %4126 = vmatpush3.bf16.msra.mxu1 %v4881_v8  ;;  %v3467_v46 = vld [vmem:[%s5192_s9 + $0xb1] sm:$0xff]  ;;  %v1411_v48 = vpack.c.bf16 %v3465_v43, %v3464_v42  ;;  %v3468_v52 = vld [vmem:[%s5192_s9 + $0xc1] sm:$0xff]  ;;  %v3469_v53 = vld [vmem:[%s5192_s9 + $0xc9] sm:$0xff] }
  0x22   : > { %4318 = vmatpush3.bf16.msra.mxu0 %v4882_v9  ;;  %4127 = vmatprep.subr.bf16.mxu1 %v4883_v10  ;;  %v5258_v49 = vpack.c.bf16 %v3467_v46, %v3466_v45  ;;  %v3510_v55 = vld [vmem:[%s5192_s9 + $0x1a] sm:$0xff]  ;;  %v3511_v56 = vld [vmem:[%s5192_s9 + $0x22] sm:$0xff]  ;;  %v1413_v58 = vpack.c.bf16 %v3469_v53, %v3468_v52  ;;  %v3512_v63 = vld [vmem:[%s5192_s9 + $0x32] sm:$0xff] }
  0x23   : > { %4319 = vmatprep.subr.bf16.mxu0 %v4884_v11  ;;  %v5277_v59 = vpack.c.bf16 %v3511_v56, %v3510_v55  ;;  %v296_v61 = vld [vmem:[%s5192_s9 + $0xd9] sm:$0xff]  ;;  %v297_v62 = vld [vmem:[%s5192_s9 + $0xe1] sm:$0xff]  ;;  %v298_v2 = vld [vmem:[%s5192_s9 + $0xf1] sm:$0xff] }
  0x24   : > { %v3513_v1 = vld [vmem:[%s5192_s9 + $0x3a] sm:$0xff]  ;;  %v3514_v5 = vld [vmem:[%s5192_s9 + $0x4a] sm:$0xff]  ;;  %v3515_v6 = vld [vmem:[%s5192_s9 + $0x52] sm:$0xff]  ;;  %v5298_v7 = vpack.c.bf16 %v297_v62, %v296_v61 }
  0x25   : > { %4128 = vmatpush3.bf16.msra.mxu1 %v4883_v10  ;;  %v299_v3 = vld [vmem:[%s5192_s9 + $0xf9] sm:$0xff]  ;;  %v5305_v9 = vpack.c.bf16 %v3513_v1, %v3512_v63  ;;  %v4904_v12 = vld [vmem:[%s5913_s1 + $0x188] sm:$0xff]   ;;  %v301_v14 = vld [vmem:[%s5192_s9 + $0x111] sm:$0xff] }
  0x26   : > { %4320 = vmatpush3.bf16.msra.mxu0 %v4884_v11  ;;  %4129 = vmatprep.subr.bf16.mxu1 %v4885_v18  ;;  %v5303_v8 = vld [vmem:[%s5913_s1 + $0x80] sm:$0xff]   ;;  %v5307_v10 = vpack.c.bf16 %v299_v3, %v298_v2  ;;  %v5309_v11 = vpack.c.bf16 %v3515_v6, %v3514_v5  ;;  %v300_v13 = vld [vmem:[%s5192_s9 + $0x109] sm:$0xff]  ;;  %v4908_v27 = vld [vmem:[%s5913_s1 + $0x198] sm:$0xff]  }
  0x27   : > { %4321 = vmatprep.subr.bf16.mxu0 %v4886_v19  ;;  %v3516_v15 = vld [vmem:[%s5192_s9 + $0x62] sm:$0xff]  ;;  %v3517_v16 = vld [vmem:[%s5192_s9 + $0x6a] sm:$0xff]  ;;  %v304_v26 = vld [vmem:[%s5192_s9 + $0x139] sm:$0xff] }
  0x28   : > { %v5332_v23 = vpack.c.bf16 %v3517_v16, %v3516_v15  ;;  %v307_v32 = vld [vmem:[%s5192_s9 + $0x159] sm:$0xff]  ;;  %v3522_v33 = vld [vmem:[%s5192_s9 + $0xaa] sm:$0xff]  ;;  %v3524_v43 = vld [vmem:[%s5192_s9 + $0xc2] sm:$0xff] }
  0x29   : > { %4130 = vmatpush3.bf16.msra.mxu1 %v4885_v18  ;;  %v303_v18 = vld [vmem:[%s5192_s9 + $0x129] sm:$0xff]  ;;  %v4910_v35 = vld [vmem:[%s5913_s1 + $0x1a0] sm:$0xff]   ;;  %v216_v55 = vld [vmem:[%s5192_s9 + $0x18] sm:$0xff] }
  0x2a   : > { %4322 = vmatpush3.bf16.msra.mxu0 %v4886_v19  ;;  %4131 = vmatprep.subr.bf16.mxu1 %v4887_v20  ;;  %v3518_v19 = vld [vmem:[%s5192_s9 + $0x7a] sm:$0xff]  ;;  %v4912_v42 = vld [vmem:[%s5913_s1 + $0x1a8] sm:$0xff]   ;;  %v218_v61 = vld [vmem:[%s5192_s9 + $0x30] sm:$0xff] }
  0x2b   : > { %4323 = vmatprep.subr.bf16.mxu0 %v4888_v21  ;;  %v214_v45 = vld [vmem:[%s5192_s9] sm:$0xff]  ;;  %v215_v46 = vld [vmem:[%s5192_s9 + $0x8] sm:$0xff]  ;;  %v219_v62 = vld [vmem:[%s5192_s9 + $0x38] sm:$0xff] }
  0x2c   : > { %v246_v53 = vpack.c.bf16 %v215_v46, %v214_v45  ;;  %v217_v56 = vld [vmem:[%s5192_s9 + $0x20] sm:$0xff]  ;;  %v3530_v63 = vld [vmem:[%s5192_s9 + $0x10a] sm:$0xff] }
  0x2d   : > { %4132 = vmatpush3.bf16.msra.mxu1 %v4887_v20  ;;  %v3519_v20 = vld [vmem:[%s5192_s9 + $0x82] sm:$0xff]  ;;  %v5407_v2 = vpack.c.bf16 %v217_v56, %v216_v55  ;;  %v3533_v15 = vld [vmem:[%s5192_s9 + $0x12a] sm:$0xff] }
  0x2e   : > { %4324 = vmatpush3.bf16.msra.mxu0 %v4888_v21  ;;  %4165 = vmatprep.subr.bf16.mxu1 %v4889_v22  ;;  %v4906_v21 = vld [vmem:[%s5913_s1 + $0x190] sm:$0xff]   ;;  %v5405_v1 = vld [vmem:[%s5913_s1 + $0x1c0] sm:$0xff]   ;;  %v220_v6 = vld [vmem:[%s5192_s9 + $0x48] sm:$0xff] }
  0x2f   : > { %4357 = vmatprep.subr.bf16.mxu0 %v4890_v25  ;;  %v222_v16 = vld [vmem:[%s5192_s9 + $0x60] sm:$0xff]  ;;  %v4919_v46 = vld [vmem:[%s5913_s1 + $0xa8] sm:$0xff]  }
  0x30   : > { %4134 = vmatmul.mubr.bf16.vlgmr.msra.gmra.mrb[0].mxu1 %v1406_v17  ;;  %v302_v17 = vld [vmem:[%s5192_s9 + $0x121] sm:$0xff] }
  0x31   : > { %4326 = vmatmul.mubr.bf16.vlgmr.msra.gmra.mrb[0].mxu0 %v1407_v28  ;;  %4166 = vmatpush3.bf16.msra.mxu1 %v4889_v22  ;;  %v5330_v22 = vpack.c.bf16 %v301_v14, %v300_v13  ;;  %v5334_v24 = vpack.c.bf16 %v303_v18, %v302_v17  ;;  %v4911_v13 = vld [vmem:[%s5913_s1 + $0x88] sm:$0xff]   ;;  %v3534_v18 = vld [vmem:[%s5192_s9 + $0x13a] sm:$0xff] }
  0x32   : > { %4358 = vmatpush3.bf16.msra.mxu0 %v4890_v25  ;;  %4137 = vmatprep.mubr.bf16.mxu1 %v1407_v28  ;;  %v5336_v25 = vpack.c.bf16 %v3519_v20, %v3518_v19  ;;  %v305_v28 = vld [vmem:[%s5192_s9 + $0x141] sm:$0xff]  ;;  %v4913_v19 = vld [vmem:[%s5913_s1 + $0x90] sm:$0xff]  }
  0x33   : > { %4359 = vmatprep.subr.bf16.mxu0 %v4891_v29  ;;  %4329 = vmatprep.mubr.bf16.mxu0 %v1408_v30  ;;  %v3532_v14 = vld [vmem:[%s5192_s9 + $0x122] sm:$0xff] }
  0x34   : > { %4167 = vmatprep.subr.bf16.mxu1 %v4892_v31  ;;  %v223_v17 = vld [vmem:[%s5192_s9 + $0x68] sm:$0xff]  ;;  %v230_v55 = vld [vmem:[%s5192_s9 + $0xc0] sm:$0xff] }
  0x35   : > { %4168 = vmatpush3.bf16.msra.mxu1 %v4892_v31  ;;  %v306_v31 = vld [vmem:[%s5192_s9 + $0x151] sm:$0xff]  ;;  %v3535_v20 = vld [vmem:[%s5192_s9 + $0x142] sm:$0xff] }
  0x36   : > { %4360 = vmatpush3.bf16.msra.mxu0 %v4891_v29  ;;  %4169 = vmatprep.subr.bf16.mxu1 %v4895_v36  ;;  %v3520_v29 = vld [vmem:[%s5192_s9 + $0x92] sm:$0xff]  ;;  %v231_v56 = vld [vmem:[%s5192_s9 + $0xc8] sm:$0xff] }
  0x37   : > { %4361 = vmatprep.subr.bf16.mxu0 %v4893_v34 }
  0x38   : > { %4138 = vmatmul.mubr.bf16.gmra.mrb[4].mxu1 %v1408_v30  ;;  %v3521_v30 = vld [vmem:[%s5192_s9 + $0x9a] sm:$0xff] }
  0x39   : > { %4330 = vmatmul.mubr.bf16.gmra.mrb[4].mxu0 %v1409_v38  ;;  %4141 = vmatprep.mubr.bf16.mxu1 %v1409_v38  ;;  %v5358_v37 = vpack.c.bf16 %v3521_v30, %v3520_v29  ;;  %v5360_v38 = vpack.c.bf16 %v307_v32, %v306_v31  ;;  %v225_v29 = vld [vmem:[%s5192_s9 + $0x80] sm:$0xff]  ;;  %v4915_v30 = vld [vmem:[%s5913_s1 + $0x98] sm:$0xff]  }
  0x3a   : > { %4362 = vmatpush3.bf16.msra.mxu0 %v4893_v34  ;;  %4333 = vmatprep.mubr.bf16.mxu0 %v1410_v39  ;;  %v3523_v34 = vld [vmem:[%s5192_s9 + $0xb2] sm:$0xff]  ;;  %v3537_v32 = vld [vmem:[%s5192_s9 + $0x15a] sm:$0xff] }
  0x3b   : > { %4363 = vmatprep.subr.bf16.mxu0 %v4894_v40  ;;  %4170 = vmatpush3.bf16.msra.mxu1 %v4895_v36  ;;  %v5356_v36 = vpack.c.bf16 %v305_v28, %v304_v26  ;;  %v5439_v26 = vpack.c.bf16 %v223_v17, %v222_v16  ;;  %v224_v28 = vld [vmem:[%s5192_s9 + $0x78] sm:$0xff]  ;;  %v4920_v16 = vld [vmem:[%s5913_s1 + $0x1c8] sm:$0xff]  }
  0x3c   : > { %4171 = vmatprep.subr.bf16.mxu1 %v4898_v41  ;;  %v3536_v31 = vld [vmem:[%s5192_s9 + $0x152] sm:$0xff]  ;;  %v236_v17 = vld [vmem:[%s5192_s9 + $0x108] sm:$0xff] }
  0x3e   : > { %4364 = vmatpush3.bf16.msra.mxu0 %v4894_v40  ;;  %v308_v40 = vld [vmem:[%s5192_s9 + $0x169] sm:$0xff] }
  0x3f   : > { %4365 = vmatprep.subr.bf16.mxu0 %v4896_v44  ;;  %4172 = vmatpush3.bf16.msra.mxu1 %v4898_v41  ;;  %v309_v41 = vld [vmem:[%s5192_s9 + $0x171] sm:$0xff] }
  0x40   : > { %4142 = vmatmul.mubr.bf16.gmra.mrb[8].mxu1 %v1410_v39  ;;  %4173 = vmatprep.subr.bf16.mxu1 %v4901_v47  ;;  %v5362_v39 = vpack.c.bf16 %v3523_v34, %v3522_v33  ;;  %v226_v33 = vld [vmem:[%s5192_s9 + $0x90] sm:$0xff]  ;;  %v227_v34 = vld [vmem:[%s5192_s9 + $0x98] sm:$0xff] }
  0x41   : > { %4334 = vmatmul.mubr.bf16.gmra.mrb[8].mxu0 %v1411_v48  ;;  %4145 = vmatprep.mubr.bf16.mxu1 %v1411_v48  ;;  %v3527_v48 = vld [vmem:[%s5192_s9 + $0xe2] sm:$0xff] }
  0x42   : > { %4366 = vmatpush3.bf16.msra.mxu0 %v4896_v44  ;;  %4337 = vmatprep.mubr.bf16.mxu0 %v5258_v49  ;;  %v3525_v44 = vld [vmem:[%s5192_s9 + $0xca] sm:$0xff] }
  0x43   : > { %4367 = vmatprep.subr.bf16.mxu0 %v4897_v50  ;;  %4174 = vmatpush3.bf16.msra.mxu1 %v4901_v47  ;;  %v3526_v47 = vld [vmem:[%s5192_s9 + $0xda] sm:$0xff]  ;;  %v5384_v52 = vpack.c.bf16 %v3525_v44, %v3524_v43  ;;  %v5463_v43 = vpack.c.bf16 %v3537_v32, %v3536_v31  ;;  %v5465_v44 = vpack.c.bf16 %v227_v34, %v226_v33  ;;  %v242_v33 = vld [vmem:[%s5192_s9 + $0x150] sm:$0xff] }
  0x44   : > { %4175 = vmatprep.subr.bf16.mxu1 %v4903_v51  ;;  %v240_v31 = vld [vmem:[%s5192_s9 + $0x138] sm:$0xff]  ;;  %v241_v32 = vld [vmem:[%s5192_s9 + $0x140] sm:$0xff] }
  0x45   : > { %v243_v34 = vld [vmem:[%s5192_s9 + $0x158] sm:$0xff] }
  0x46   : > { %4368 = vmatpush3.bf16.msra.mxu0 %v4897_v50  ;;  %v4914_v50 = vld [vmem:[%s5913_s1 + $0x1b0] sm:$0xff]  }
  0x47   : > { %4369 = vmatprep.subr.bf16.mxu0 %v4899_v54  ;;  %4176 = vmatpush3.bf16.msra.mxu1 %v4903_v51  ;;  %v5382_v51 = vpack.c.bf16 %v309_v41, %v308_v40  ;;  %v3539_v40 = vld [vmem:[%s5192_s9 + $0x172] sm:$0xff]  ;;  %v4917_v41 = vld [vmem:[%s5913_s1 + $0xa0] sm:$0xff]  }
  0x48   : > { %4146 = vmatmul.mubr.bf16.gmra.mrb[12].mxu1 %v5258_v49  ;;  %4177 = vmatprep.subr.bf16.mxu1 %v4905_v57 }
  0x49   : > { %4338 = vmatmul.mubr.bf16.gmra.mrb[12].mxu0 %v1413_v58  ;;  %4149 = vmatprep.mubr.bf16.mxu1 %v1413_v58  ;;  %v3528_v58 = vld [vmem:[%s5192_s9 + $0xf2] sm:$0xff] }
  0x4a   : > { %4370 = vmatpush3.bf16.msra.mxu0 %v4899_v54  ;;  %4373 = vmatprep.mubr.bf16.mxu0 %v5277_v59  ;;  %v5386_v54 = vpack.c.bf16 %v3527_v48, %v3526_v47  ;;  %v228_v47 = vld [vmem:[%s5192_s9 + $0xa8] sm:$0xff]  ;;  %v229_v48 = vld [vmem:[%s5192_s9 + $0xb0] sm:$0xff] }
  0x4b   : > { %4371 = vmatprep.subr.bf16.mxu0 %v4900_v60  ;;  %4178 = vmatpush3.bf16.msra.mxu1 %v4905_v57  ;;  %v4916_v57 = vld [vmem:[%s5913_s1 + $0x1b8] sm:$0xff]  }
  0x4c   : > { %4179 = vmatprep.subr.bf16.mxu1 %v4907_v0 }
  0x4e   : > { %4372 = vmatpush3.bf16.msra.mxu0 %v4900_v60  ;;  %v3529_v60 = vld [vmem:[%s5192_s9 + $0xfa] sm:$0xff] }
  0x4f   : > { %4405 = vmatprep.subr.bf16.mxu0 %v4902_v4  ;;  %4180 = vmatpush3.bf16.msra.mxu1 %v4907_v0  ;;  %v3531_v0 = vld [vmem:[%s5192_s9 + $0x112] sm:$0xff]  ;;  %v5409_v3 = vpack.c.bf16 %v3529_v60, %v3528_v58  ;;  %v5485_v58 = vpack.c.bf16 %v229_v48, %v228_v47  ;;  %v244_v47 = vld [vmem:[%s5192_s9 + $0x168] sm:$0xff] }
  0x50   : > { %4150 = vmatmul.mubr.bf16.gmra.mrb[16].mxu1 %v5298_v7  ;;  %4213 = vmatprep.subr.bf16.mxu1 %v5303_v8  ;;  %v5413_v5 = vpack.c.bf16 %v3531_v0, %v3530_v63  ;;  %v232_v63 = vld [vmem:[%s5192_s9 + $0xd8] sm:$0xff]  ;;  %v233_v0 = vld [vmem:[%s5192_s9 + $0xe0] sm:$0xff]  ;;  %v245_v48 = vld [vmem:[%s5192_s9 + $0x170] sm:$0xff] }
  0x51   : > { %4374 = vmatmul.mubr.bf16.vlgmr.msra.gmra.mrb[0].mxu0 %v5305_v9  ;;  %4153 = vmatprep.mubr.bf16.mxu1 %v5307_v10 }
  0x52   : > { %4406 = vmatpush3.bf16.msra.mxu0 %v4902_v4  ;;  %4377 = vmatprep.mubr.bf16.mxu0 %v5309_v11  ;;  %v5411_v4 = vpack.c.bf16 %v219_v62, %v218_v61  ;;  %v5487_v61 = vpack.c.bf16 %v231_v56, %v230_v55  ;;  %v4923_v62 = vld [vmem:[%s5913_s1 + $0xb8] sm:$0xff]   ;;  %v4930_v55 = vld [vmem:[%s5913_s1 + $0x1f0] sm:$0xff]   ;;  %v5560_v56 = vpack.c.bf16 %v245_v48, %v244_v47 }
  0x53   : > { %4407 = vmatprep.subr.bf16.mxu0 %v4904_v12  ;;  %v3630_v47 = vld [vmem:[%s5192_s9 + $0x91] sm:$0xff]  ;;  %v3631_v48 = vld [vmem:[%s5192_s9 + $0x99] sm:$0xff] }
  0x56   : > { %4408 = vmatpush3.bf16.msra.mxu0 %v4904_v12  ;;  %v221_v12 = vld [vmem:[%s5192_s9 + $0x50] sm:$0xff] }
  0x57   : > { %4409 = vmatprep.subr.bf16.mxu0 %v4906_v21 }
  0x58   : > { %4154 = vmatmul.mubr.bf16.gmra.mrb[20].mxu1 %v5330_v22 }
  0x59   : > { %4378 = vmatmul.mubr.bf16.gmra.mrb[4].mxu0 %v5332_v23  ;;  %4157 = vmatprep.mubr.bf16.mxu1 %v5334_v24 }
  0x5a   : > { %4381 = vmatprep.mubr.bf16.mxu0 %v5336_v25  ;;  %4410 = vmatpush3.bf16.msra.mxu0 %v4906_v21  ;;  %v5435_v21 = vpack.c.bf16 %v221_v12, %v220_v6  ;;  %v234_v6 = vld [vmem:[%s5192_s9 + $0xf0] sm:$0xff]  ;;  %v235_v12 = vld [vmem:[%s5192_s9 + $0xf8] sm:$0xff] }
  0x5b   : > { %4411 = vmatprep.subr.bf16.mxu0 %v4908_v27 }
  0x5e   : > { %4412 = vmatpush3.bf16.msra.mxu0 %v4908_v27  ;;  %v5441_v27 = vpack.c.bf16 %v3535_v20, %v3534_v18  ;;  %v237_v18 = vld [vmem:[%s5192_s9 + $0x110] sm:$0xff]  ;;  %v239_v20 = vld [vmem:[%s5192_s9 + $0x128] sm:$0xff] }
  0x5f   : > { %4413 = vmatprep.subr.bf16.mxu0 %v4910_v35 }
  0x60   : > { %4158 = vmatmul.mubr.bf16.gmra.mrb[24].mxu1 %v5356_v36 }
  0x61   : > { %4382 = vmatmul.mubr.bf16.gmra.mrb[8].mxu0 %v5358_v37  ;;  %4161 = vmatprep.mubr.bf16.mxu1 %v5360_v38 }
  0x62   : > { %4385 = vmatprep.mubr.bf16.mxu0 %v5362_v39  ;;  %4414 = vmatpush3.bf16.msra.mxu0 %v4910_v35  ;;  %v3538_v35 = vld [vmem:[%s5192_s9 + $0x16a] sm:$0xff] }
  0x63   : > { %4415 = vmatprep.subr.bf16.mxu0 %v4912_v42  ;;  %v5467_v45 = vpack.c.bf16 %v3539_v40, %v3538_v35  ;;  %v4926_v35 = vld [vmem:[%s5913_s1 + $0x1e0] sm:$0xff]   ;;  %v5542_v40 = vpack.c.bf16 %v241_v32, %v240_v31  ;;  %v3627_v32 = vld [vmem:[%s5192_s9 + $0x69] sm:$0xff] }
  0x64   : > { %v3626_v31 = vld [vmem:[%s5192_s9 + $0x61] sm:$0xff] }
  0x66   : > { %4416 = vmatpush3.bf16.msra.mxu0 %v4912_v42  ;;  %v5461_v42 = vpack.c.bf16 %v225_v29, %v224_v28  ;;  %v4922_v28 = vld [vmem:[%s5913_s1 + $0x1d0] sm:$0xff]   ;;  %v5524_v29 = vpack.c.bf16 %v237_v18, %v236_v17  ;;  %v3623_v18 = vld [vmem:[%s5192_s9 + $0x39] sm:$0xff] }
  0x67   : > { %4417 = vmatprep.subr.bf16.mxu0 %v4914_v50  ;;  %v3622_v17 = vld [vmem:[%s5192_s9 + $0x31] sm:$0xff] }
  0x68   : > { %4162 = vmatmul.mubr.bf16.gmra.mrb[28].mxu1 %v5382_v51 }
  0x69   : > { %4386 = vmatmul.mubr.bf16.gmra.mrb[12].mxu0 %v5384_v52  ;;  %4181 = vmatprep.mubr.bf16.mxu1 %v246_v53  ;;  %v3541_v53 = vld [vmem:[%s5192_s9 + $0x18a] sm:$0xff] }
  0x6a   : > { %4389 = vmatprep.mubr.bf16.mxu0 %v5386_v54  ;;  %4418 = vmatpush3.bf16.msra.mxu0 %v4914_v50  ;;  %v3540_v50 = vld [vmem:[%s5192_s9 + $0x182] sm:$0xff] }
  0x6b   : > { %4419 = vmatprep.subr.bf16.mxu0 %v4916_v57  ;;  %v1727_v60 = vpack.c.bf16 %v3541_v53, %v3540_v50  ;;  %v761_v50 = vld [vmem:[%s5192_s9 + $0x2] sm:$0xff]  ;;  %v762_v53 = vld [vmem:[%s5192_s9 + $0xa] sm:$0xff] }
  0x6e   : > { %4420 = vmatpush3.bf16.msra.mxu0 %v4916_v57  ;;  %v4921_v57 = vld [vmem:[%s5913_s1 + $0xb0] sm:$0xff]  }
  0x6f   : > { %4453 = vmatprep.subr.bf16.mxu0 %v5405_v1 }
  0x70   : > { %4182 = vmatmul.mubr.bf16.vlgmr.msra.gmra.mrb[0].mxu1 %v5407_v2 }
  0x71   : > { %4390 = vmatmul.mubr.bf16.gmra.mrb[16].mxu0 %v5409_v3  ;;  %4214 = vmatpush3.bf16.msra.mxu1 %v5303_v8  ;;  %v5437_v8 = vpack.c.bf16 %v3533_v15, %v3532_v14  ;;  %v5504_v14 = vpack.c.bf16 %v233_v0, %v232_v63  ;;  %v5506_v15 = vpack.c.bf16 %v235_v12, %v234_v6  ;;  %v4927_v63 = vld [vmem:[%s5913_s1 + $0xc8] sm:$0xff]   ;;  %v4929_v0 = vld [vmem:[%s5913_s1 + $0xd0] sm:$0xff]   ;;  %v4933_v12 = vld [vmem:[%s5913_s1 + $0xe0] sm:$0xff]  }
  0x72   : > { %4185 = vmatprep.mubr.bf16.mxu1 %v5411_v4  ;;  %4393 = vmatprep.mubr.bf16.mxu0 %v5413_v5  ;;  %v3595_v6 = vld [vmem:[%s5192_s9 + $0x188] sm:$0xff] }
  0x73   : > { %4215 = vmatprep.subr.bf16.mxu1 %v4911_v13 }
  0x75   : > { %4216 = vmatpush3.bf16.msra.mxu1 %v4911_v13  ;;  %v5502_v13 = vld [vmem:[%s5913_s1 + $0xc0] sm:$0xff]  }
  0x76   : > { %4217 = vmatprep.subr.bf16.mxu1 %v4913_v19 }
  0x78   : > { %4186 = vmatmul.mubr.bf16.gmra.mrb[4].mxu1 %v5435_v21 }
  0x79   : > { %4394 = vmatmul.mubr.bf16.gmra.mrb[20].mxu0 %v5437_v8  ;;  %4189 = vmatprep.mubr.bf16.mxu1 %v5439_v26 }
  0x7a   : > { %4397 = vmatprep.mubr.bf16.mxu0 %v5441_v27  ;;  %4218 = vmatpush3.bf16.msra.mxu1 %v4913_v19  ;;  %v238_v19 = vld [vmem:[%s5192_s9 + $0x120] sm:$0xff] }
  0x7b   : > { %4219 = vmatprep.subr.bf16.mxu1 %v4915_v30 }
  0x7e   : > { %4220 = vmatpush3.bf16.msra.mxu1 %v4915_v30  ;;  %v5526_v30 = vpack.c.bf16 %v239_v20, %v238_v19  ;;  %v2325_v20 = vpack.c.bf16 %v3623_v18, %v3622_v17  ;;  %v3690_v17 = vld [vmem:[%s5192_s9 + $0xc2] sm:$0xff]  ;;  %v3691_v18 = vld [vmem:[%s5192_s9 + $0xca] sm:$0xff] }
  0x7f   : > { %4221 = vmatprep.subr.bf16.mxu1 %v4917_v41 }
  0x80   : > { %4190 = vmatmul.mubr.bf16.gmra.mrb[8].mxu1 %v5461_v42 }
  0x81   : > { %4398 = vmatmul.mubr.bf16.gmra.mrb[24].mxu0 %v5463_v43  ;;  %4193 = vmatprep.mubr.bf16.mxu1 %v5465_v44 }
  0x82   : > { %4401 = vmatprep.mubr.bf16.mxu0 %v5467_v45  ;;  %4222 = vmatpush3.bf16.msra.mxu1 %v4917_v41  ;;  %v5544_v41 = vpack.c.bf16 %v243_v34, %v242_v33  ;;  %v2327_v34 = vpack.c.bf16 %v3627_v32, %v3626_v31 }
  0x83   : > { %4223 = vmatprep.subr.bf16.mxu1 %v4919_v46 }
  0x86   : > { %4224 = vmatpush3.bf16.msra.mxu1 %v4919_v46  ;;  %v4928_v46 = vld [vmem:[%s5913_s1 + $0x1e8] sm:$0xff]  }
  0x87   : > { %4225 = vmatprep.subr.bf16.mxu1 %v4921_v57 }
  0x88   : > { %4194 = vmatmul.mubr.bf16.gmra.mrb[12].mxu1 %v5485_v58 }
  0x89   : > { %4402 = vmatmul.mubr.bf16.gmra.mrb[28].mxu0 %v1727_v60  ;;  %4197 = vmatprep.mubr.bf16.mxu1 %v5487_v61  ;;  %v4932_v60 = vld [vmem:[%s5913_s1 + $0x1f8] sm:$0xff]  }
  0x8a   : > { %4421 = vmatprep.mubr.bf16.mxu0 %v5411_v4  ;;  %4226 = vmatpush3.bf16.msra.mxu1 %v4921_v57  ;;  %v793_v57 = vpack.c.bf16 %v762_v53, %v761_v50  ;;  %v4938_v50 = vld [vmem:[%s5913_s1 + $0x210] sm:$0xff]  }
  0x8b   : > { %4227 = vmatprep.subr.bf16.mxu1 %v4923_v62 }
  0x8e   : > { %4228 = vmatpush3.bf16.msra.mxu1 %v4923_v62  ;;  %v4934_v62 = vld [vmem:[%s5913_s1 + $0x200] sm:$0xff]  }
  0x8f   : > { %4261 = vmatprep.subr.bf16.mxu1 %v5502_v13 }
  0x90   : > { %4198 = vmatmul.mubr.bf16.gmra.mrb[16].mxu1 %v5504_v14 }
  0x91   : > { %4422 = vmatmul.mubr.bf16.vlgmr.msra.gmra.mrb[0].mxu0 %v5435_v21  ;;  %4201 = vmatprep.mubr.bf16.mxu1 %v5506_v15 }
  0x92   : > { %4454 = vmatpush3.bf16.msra.mxu0 %v5405_v1  ;;  %4425 = vmatprep.mubr.bf16.mxu0 %v5439_v26  ;;  %v4924_v1 = vld [vmem:[%s5913_s1 + $0x1d8] sm:$0xff]  }
  0x93   : > { %4455 = vmatprep.subr.bf16.mxu0 %v4920_v16 }
  0x96   : > { %4456 = vmatpush3.bf16.msra.mxu0 %v4920_v16  ;;  %v3597_v16 = vld [vmem:[%s5192_s9 + $0x1a0] sm:$0xff] }
  0x97   : > { %4457 = vmatprep.subr.bf16.mxu0 %v4922_v28 }
  0x98   : > { %4202 = vmatmul.mubr.bf16.gmra.mrb[20].mxu1 %v5524_v29 }
  0x99   : > { %4426 = vmatmul.mubr.bf16.gmra.mrb[4].mxu0 %v5461_v42  ;;  %4205 = vmatprep.mubr.bf16.mxu1 %v5526_v30 }
  0x9a   : > { %4429 = vmatprep.mubr.bf16.mxu0 %v5465_v44  ;;  %4458 = vmatpush3.bf16.msra.mxu0 %v4922_v28  ;;  %v3624_v28 = vld [vmem:[%s5192_s9 + $0x49] sm:$0xff] }
  0x9b   : > { %4459 = vmatprep.subr.bf16.mxu0 %v4924_v1 }
  0x9e   : > { %4460 = vmatpush3.bf16.msra.mxu0 %v4924_v1  ;;  %v3625_v1 = vld [vmem:[%s5192_s9 + $0x51] sm:$0xff] }
  0x9f   : > { %4461 = vmatprep.subr.bf16.mxu0 %v4926_v35  ;;  %v2326_v33 = vpack.c.bf16 %v3625_v1, %v3624_v28  ;;  %v3694_v28 = vld [vmem:[%s5192_s9 + $0xf2] sm:$0xff]  ;;  %v3695_v1 = vld [vmem:[%s5192_s9 + $0xfa] sm:$0xff] }
  0xa0   : > { %4206 = vmatmul.mubr.bf16.gmra.mrb[24].mxu1 %v5542_v40  ;;  %v2639_v32 = vpack.c.bf16 %v3695_v1, %v3694_v28 }
  0xa1   : > { %4430 = vmatmul.mubr.bf16.gmra.mrb[8].mxu0 %v5485_v58  ;;  %4209 = vmatprep.mubr.bf16.mxu1 %v5544_v41 }
  0xa2   : > { %4433 = vmatprep.mubr.bf16.mxu0 %v5487_v61  ;;  %4462 = vmatpush3.bf16.msra.mxu0 %v4926_v35  ;;  %v3628_v35 = vld [vmem:[%s5192_s9 + $0x79] sm:$0xff] }
  0xa3   : > { %4463 = vmatprep.subr.bf16.mxu0 %v4928_v46 }
  0xa6   : > { %4464 = vmatpush3.bf16.msra.mxu0 %v4928_v46  ;;  %v3629_v46 = vld [vmem:[%s5192_s9 + $0x81] sm:$0xff] }
  0xa7   : > { %4465 = vmatprep.subr.bf16.mxu0 %v4930_v55  ;;  %v2328_v53 = vpack.c.bf16 %v3629_v46, %v3628_v35  ;;  %v3475_v35 = vld [vmem:[%s5192_s9 + $0x111] sm:$0xff]  ;;  %v3698_v46 = vld [vmem:[%s5192_s9 + $0x122] sm:$0xff] }
  0xa8   : > { %4210 = vmatmul.mubr.bf16.gmra.mrb[28].mxu1 %v5560_v56 }
  0xa9   : > { %4434 = vmatmul.mubr.bf16.gmra.mrb[12].mxu0 %v5504_v14  ;;  %4229 = vmatprep.mubr.bf16.mxu1 %v793_v57  ;;  %v3635_v57 = vld [vmem:[%s5192_s9 + $0xc9] sm:$0xff] }
  0xaa   : > { %4437 = vmatprep.mubr.bf16.mxu0 %v5506_v15  ;;  %4466 = vmatpush3.bf16.msra.mxu0 %v4930_v55  ;;  %v2329_v55 = vpack.c.bf16 %v3631_v48, %v3630_v47  ;;  %v3699_v47 = vld [vmem:[%s5192_s9 + $0x12a] sm:$0xff] }
  0xab   : > { %4467 = vmatprep.subr.bf16.mxu0 %v4932_v60 }
  0xae   : > { %4468 = vmatpush3.bf16.msra.mxu0 %v4932_v60  ;;  %v4941_v60 = vld [vmem:[%s5913_s1 + $0x220] sm:$0xff]  }
  0xaf   : > { %4501 = vmatprep.subr.bf16.mxu0 %v4934_v62 }
  0xb0   : > { %4230 = vmatmul.mubr.bf16.vlgmr.msra.gmra.mrb[0].mxu1 %v5277_v59  ;;  %v4931_v59 = vld [vmem:[%s5913_s1 + $0xd8] sm:$0xff]  }
  0xb1   : > { %4438 = vmatmul.mubr.bf16.gmra.mrb[16].mxu0 %v5524_v29  ;;  %4262 = vmatpush3.bf16.msra.mxu1 %v5502_v13 }
  0xb2   : > { %4233 = vmatprep.mubr.bf16.mxu1 %v5305_v9  ;;  %4441 = vmatprep.mubr.bf16.mxu0 %v5526_v30  ;;  %v3594_v9 = vld [vmem:[%s5192_s9 + $0x180] sm:$0xff] }
  0xb3   : > { %4263 = vmatprep.subr.bf16.mxu1 %v4927_v63  ;;  %v5594_v13 = vpack.c.bf16 %v3595_v6, %v3594_v9  ;;  %v3685_v6 = vld [vmem:[%s5192_s9 + $0x82] sm:$0xff] }
  0xb5   : > { %4264 = vmatpush3.bf16.msra.mxu1 %v4927_v63  ;;  %v4942_v63 = vld [vmem:[%s5913_s1 + $0x228] sm:$0xff]  }
  0xb6   : > { %4265 = vmatprep.subr.bf16.mxu1 %v4929_v0 }
  0xb8   : > { %4234 = vmatmul.mubr.bf16.gmra.mrb[4].mxu1 %v5309_v11  ;;  %v4935_v11 = vld [vmem:[%s5913_s1 + $0xe8] sm:$0xff]  }
  0xb9   : > { %4442 = vmatmul.mubr.bf16.gmra.mrb[20].mxu0 %v5542_v40  ;;  %4237 = vmatprep.mubr.bf16.mxu1 %v5332_v23  ;;  %v3596_v23 = vld [vmem:[%s5192_s9 + $0x198] sm:$0xff] }
  0xba   : > { %4445 = vmatprep.mubr.bf16.mxu0 %v5544_v41  ;;  %4266 = vmatpush3.bf16.msra.mxu1 %v4929_v0  ;;  %v2034_v19 = vpack.c.bf16 %v3597_v16, %v3596_v23  ;;  %v3683_v0 = vld [vmem:[%s5192_s9 + $0x6a] sm:$0xff] }
  0xbb   : > { %4267 = vmatprep.subr.bf16.mxu1 %v4931_v59 }
  0xbe   : > { %4268 = vmatpush3.bf16.msra.mxu1 %v4931_v59  ;;  %v4952_v59 = vld [vmem:[%s5913_s1 + $0x138] sm:$0xff]  }
  0xbf   : > { %4269 = vmatprep.subr.bf16.mxu1 %v4933_v12 }
  0xc0   : > { %4238 = vmatmul.mubr.bf16.gmra.mrb[8].mxu1 %v5336_v25  ;;  %v4937_v25 = vld [vmem:[%s5913_s1 + $0xf0] sm:$0xff]  }
  0xc1   : > { %4446 = vmatmul.mubr.bf16.gmra.mrb[24].mxu0 %v5560_v56  ;;  %4241 = vmatprep.mubr.bf16.mxu1 %v5358_v37  ;;  %v4939_v37 = vld [vmem:[%s5913_s1 + $0xf8] sm:$0xff]  }
  0xc2   : > { %4449 = vmatprep.mubr.bf16.mxu0 %v5594_v13  ;;  %4270 = vmatpush3.bf16.msra.mxu1 %v4933_v12  ;;  %v3686_v12 = vld [vmem:[%s5192_s9 + $0x92] sm:$0xff] }
  0xc3   : > { %4271 = vmatprep.subr.bf16.mxu1 %v4935_v11 }
  0xc6   : > { %4272 = vmatpush3.bf16.msra.mxu1 %v4935_v11  ;;  %v3687_v11 = vld [vmem:[%s5192_s9 + $0x9a] sm:$0xff] }
  0xc7   : > { %4273 = vmatprep.subr.bf16.mxu1 %v4937_v25  ;;  %v2635_v16 = vpack.c.bf16 %v3687_v11, %v3686_v12 }
  0xc8   : > { %4242 = vmatmul.mubr.bf16.gmra.mrb[12].mxu1 %v5362_v39  ;;  %v4936_v39 = vld [vmem:[%s5913_s1 + $0x208] sm:$0xff]  }
  0xc9   : > { %4450 = vmatmul.mubr.bf16.gmra.mrb[28].mxu0 %v2034_v19  ;;  %4245 = vmatprep.mubr.bf16.mxu1 %v5384_v52  ;;  %v4945_v52 = vld [vmem:[%s5913_s1 + $0x100] sm:$0xff]   ;;  %v2637_v19 = vpack.c.bf16 %v3691_v18, %v3690_v17 }
  0xca   : > { %4469 = vmatprep.mubr.bf16.mxu0 %v2325_v20  ;;  %4274 = vmatpush3.bf16.msra.mxu1 %v4937_v25  ;;  %v3470_v20 = vld [vmem:[%s5192_s9 + $0xd9] sm:$0xff] }
  0xcb   : > { %4275 = vmatprep.subr.bf16.mxu1 %v4939_v37 }
  0xce   : > { %4276 = vmatpush3.bf16.msra.mxu1 %v4939_v37  ;;  %v3471_v37 = vld [vmem:[%s5192_s9 + $0xe1] sm:$0xff] }
  0xcf   : > { %4549 = vmatprep.subr.bf16.mxu1 %v4945_v52 }
  0xd0   : > { %4246 = vmatmul.mubr.bf16.gmra.mrb[16].mxu1 %v5386_v54  ;;  %v4940_v54 = vld [vmem:[%s5913_s1 + $0x218] sm:$0xff]  }
  0xd1   : > { %4470 = vmatmul.mubr.bf16.vlgmr.msra.gmra.mrb[0].mxu0 %v2326_v33  ;;  %4249 = vmatprep.mubr.bf16.mxu1 %v5409_v3  ;;  %v3634_v3 = vld [vmem:[%s5192_s9 + $0xc1] sm:$0xff]  ;;  %v3473_v33 = vld [vmem:[%s5192_s9 + $0xf9] sm:$0xff] }
  0xd2   : > { %4502 = vmatpush3.bf16.msra.mxu0 %v4934_v62  ;;  %4473 = vmatprep.mubr.bf16.mxu0 %v2327_v34  ;;  %v2331_v62 = vpack.c.bf16 %v3635_v57, %v3634_v3  ;;  %v3696_v34 = vld [vmem:[%s5192_s9 + $0x10a] sm:$0xff]  ;;  %v3700_v3 = vld [vmem:[%s5192_s9 + $0x13a] sm:$0xff]  ;;  %v3701_v57 = vld [vmem:[%s5192_s9 + $0x142] sm:$0xff] }
  0xd3   : > { %4503 = vmatprep.subr.bf16.mxu0 %v4936_v39 }
  0xd6   : > { %4504 = vmatpush3.bf16.msra.mxu0 %v4936_v39  ;;  %v3697_v39 = vld [vmem:[%s5192_s9 + $0x112] sm:$0xff] }
  0xd7   : > { %4505 = vmatprep.subr.bf16.mxu0 %v4938_v50  ;;  %v2640_v48 = vpack.c.bf16 %v3697_v39, %v3696_v34 }
  0xd8   : > { %4250 = vmatmul.mubr.bf16.gmra.mrb[20].mxu1 %v5413_v5  ;;  %v4943_v5 = vld [vmem:[%s5913_s1 + $0x230] sm:$0xff]  }
  0xd9   : > { %4474 = vmatmul.mubr.bf16.gmra.mrb[4].mxu0 %v2328_v53  ;;  %4253 = vmatprep.mubr.bf16.mxu1 %v5437_v8  ;;  %v4944_v8 = vld [vmem:[%s5913_s1 + $0x238] sm:$0xff]   ;;  %v2641_v53 = vpack.c.bf16 %v3699_v47, %v3698_v46 }
  0xda   : > { %4477 = vmatprep.mubr.bf16.mxu0 %v2329_v55  ;;  %4506 = vmatpush3.bf16.msra.mxu0 %v4938_v50  ;;  %v3476_v55 = vld [vmem:[%s5192_s9 + $0x121] sm:$0xff] }
  0xdb   : > { %4507 = vmatprep.subr.bf16.mxu0 %v4940_v54 }
  0xde   : > { %4508 = vmatpush3.bf16.msra.mxu0 %v4940_v54  ;;  %v3477_v54 = vld [vmem:[%s5192_s9 + $0x129] sm:$0xff] }
  0xdf   : > { %4509 = vmatprep.subr.bf16.mxu0 %v4941_v60 }
  0xe0   : > { %4254 = vmatmul.mubr.bf16.gmra.mrb[24].mxu1 %v5441_v27  ;;  %v4950_v27 = vld [vmem:[%s5913_s1 + $0x128] sm:$0xff]  }
  0xe1   : > { %4478 = vmatmul.mubr.bf16.gmra.mrb[8].mxu0 %v5258_v49  ;;  %4257 = vmatprep.mubr.bf16.mxu1 %v5463_v43  ;;  %v4946_v49 = vld [vmem:[%s5913_s1 + $0x108] sm:$0xff]   ;;  %v4951_v43 = vld [vmem:[%s5913_s1 + $0x130] sm:$0xff]  }
  0xe2   : > { %4481 = vmatprep.mubr.bf16.mxu0 %v2331_v62  ;;  %4510 = vmatpush3.bf16.msra.mxu0 %v4941_v60  ;;  %v3478_v60 = vld [vmem:[%s5192_s9 + $0x139] sm:$0xff]  ;;  %v3479_v62 = vld [vmem:[%s5192_s9 + $0x141] sm:$0xff] }
  0xe3   : > { %4511 = vmatprep.subr.bf16.mxu0 %v4942_v63 }
  0xe6   : > { %4512 = vmatpush3.bf16.msra.mxu0 %v4942_v63  ;;  %v3702_v63 = vld [vmem:[%s5192_s9 + $0x152] sm:$0xff] }
  0xe7   : > { %4513 = vmatprep.subr.bf16.mxu0 %v4943_v5 }
  0xe8   : > { %4258 = vmatmul.mubr.bf16.gmra.mrb[28].mxu1 %v5467_v45  ;;  %v3681_v45 = vld [vmem:[%s5192_s9 + $0x52] sm:$0xff] }
  0xe9   : > { %4482 = vmatmul.mubr.bf16.gmra.mrb[12].mxu0 %v5298_v7  ;;  %4277 = vmatprep.mubr.bf16.mxu1 %v5407_v2  ;;  %v4947_v7 = vld [vmem:[%s5913_s1 + $0x110] sm:$0xff]  }
  0xea   : > { %4485 = vmatprep.mubr.bf16.mxu0 %v5307_v10  ;;  %4514 = vmatpush3.bf16.msra.mxu0 %v4943_v5  ;;  %v3650_v10 = vld [vmem:[%s5192_s9 + $0x181] sm:$0xff] }
  0xeb   : > { %4515 = vmatprep.subr.bf16.mxu0 %v4944_v8  ;;  %v3703_v5 = vld [vmem:[%s5192_s9 + $0x15a] sm:$0xff] }
  0xee   : > { %4516 = vmatpush3.bf16.msra.mxu0 %v4944_v8  ;;  %v1417_v8 = vpack.c.bf16 %v3477_v54, %v3476_v55 }
  0xf0   : > { %4278 = vmatmul.mubr.bf16.vlgmr.msra.gmra.mrb[0].mxu1 %v5411_v4  ;;  %v3653_v4 = vld [vmem:[%s5192_s9 + $0x1a1] sm:$0xff] }
  0xf1   : > { %4486 = vmatmul.mubr.bf16.gmra.mrb[16].mxu0 %v5330_v22  ;;  %4557 = vmatpush3.bf16.msra.mxu1 %v4945_v52  ;;  %v3651_v22 = vld [vmem:[%s5192_s9 + $0x189] sm:$0xff] }
  0xf2   : > { %4281 = vmatprep.mubr.bf16.mxu1 %v5435_v21  ;;  %4489 = vmatprep.mubr.bf16.mxu0 %v5334_v24  ;;  %v4948_v24 = vld [vmem:[%s5913_s1 + $0x118] sm:$0xff]   ;;  %v5679_v2 = vpack.c.bf16 %v3651_v22, %v3650_v10  ;;  %v3474_v52 = vld [vmem:[%s5192_s9 + $0x109] sm:$0xff]  ;;  %v2643_v10 = vpack.c.bf16 %v3703_v5, %v3702_v63 }
  0xf3   : > { %4550 = vmatprep.subr.bf16.mxu1 %v4946_v49  ;;  %v3678_v21 = vld [vmem:[%s5192_s9 + $0x32] sm:$0xff]  ;;  %v1416_v50 = vpack.c.bf16 %v3475_v35, %v3474_v52 }
  0xf4   : > { %v3480_v22 = vld [vmem:[%s5192_s9 + $0x151] sm:$0xff] }
  0xf5   : > { %4558 = vmatpush3.bf16.msra.mxu1 %v4946_v49  ;;  %v2642_v49 = vpack.c.bf16 %v3701_v57, %v3700_v3 }
  0xf6   : > { %4551 = vmatprep.subr.bf16.mxu1 %v4947_v7 }
  0xf8   : > { %4282 = vmatmul.mubr.bf16.gmra.mrb[4].mxu1 %v5439_v26  ;;  %v3679_v26 = vld [vmem:[%s5192_s9 + $0x3a] sm:$0xff] }
  0xf9   : > { %4490 = vmatmul.mubr.bf16.gmra.mrb[20].mxu0 %v5356_v36  ;;  %4285 = vmatprep.mubr.bf16.mxu1 %v5461_v42  ;;  %v4949_v36 = vld [vmem:[%s5913_s1 + $0x120] sm:$0xff]  }
  0xfa   : > { %4493 = vmatprep.mubr.bf16.mxu0 %v5360_v38  ;;  %4559 = vmatpush3.bf16.msra.mxu1 %v4947_v7  ;;  %v3652_v38 = vld [vmem:[%s5192_s9 + $0x199] sm:$0xff]  ;;  %v1418_v7 = vpack.c.bf16 %v3479_v62, %v3478_v60 }
  0xfb   : > { %4552 = vmatprep.subr.bf16.mxu1 %v4948_v24  ;;  %v2340_v42 = vpack.c.bf16 %v3653_v4, %v3652_v38  ;;  %v3705_v38 = vld [vmem:[%s5192_s9 + $0x172] sm:$0xff]  ;;  %v3482_v4 = vld [vmem:[%s5192_s9 + $0x169] sm:$0xff] }
  0xfe   : > { %4560 = vmatpush3.bf16.msra.mxu1 %v4948_v24  ;;  %v3481_v24 = vld [vmem:[%s5192_s9 + $0x159] sm:$0xff] }
  0xff   : > { %4553 = vmatprep.subr.bf16.mxu1 %v4949_v36 }
 0x100   : > { %4286 = vmatmul.mubr.bf16.gmra.mrb[8].mxu1 %v5465_v44  ;;  %v3680_v44 = vld [vmem:[%s5192_s9 + $0x4a] sm:$0xff] }
 0x101   : > { %4494 = vmatmul.mubr.bf16.gmra.mrb[24].mxu0 %v5382_v51  ;;  %4289 = vmatprep.mubr.bf16.mxu1 %v5485_v58  ;;  %v2631_v51 = vpack.c.bf16 %v3679_v26, %v3678_v21  ;;  %v3682_v58 = vld [vmem:[%s5192_s9 + $0x62] sm:$0xff]  ;;  %v2632_v9 = vpack.c.bf16 %v3681_v45, %v3680_v44  ;;  %v3483_v21 = vld [vmem:[%s5192_s9 + $0x171] sm:$0xff]  ;;  %v3708_v45 = vld [vmem:[%s5192_s9 + $0x19a] sm:$0xff] }
 0x102   : > { %4497 = vmatprep.mubr.bf16.mxu0 %v5679_v2  ;;  %4561 = vmatpush3.bf16.msra.mxu1 %v4949_v36  ;;  %v3704_v36 = vld [vmem:[%s5192_s9 + $0x16a] sm:$0xff]  ;;  %v3706_v26 = vld [vmem:[%s5192_s9 + $0x182] sm:$0xff] }
 0x103   : > { %4554 = vmatprep.subr.bf16.mxu1 %v4950_v27 }
 0x106   : > { %4562 = vmatpush3.bf16.msra.mxu1 %v4950_v27  ;;  %v3707_v27 = vld [vmem:[%s5192_s9 + $0x18a] sm:$0xff] }
 0x107   : > { %4555 = vmatprep.subr.bf16.mxu1 %v4951_v43  ;;  %v2645_v44 = vpack.c.bf16 %v3707_v27, %v3706_v26 }
 0x108   : > { %4290 = vmatmul.mubr.bf16.gmra.mrb[12].mxu1 %v5487_v61  ;;  %v2633_v61 = vpack.c.bf16 %v3683_v0, %v3682_v58  ;;  %v3709_v58 = vld [vmem:[%s5192_s9 + $0x1a2] sm:$0xff] }
 0x109   : > { %4498 = vmatmul.mubr.bf16.gmra.mrb[28].mxu0 %v2340_v42  ;;  %4293 = vmatprep.mubr.bf16.mxu1 %v5504_v14  ;;  %v3684_v14 = vld [vmem:[%s5192_s9 + $0x7a] sm:$0xff]  ;;  %v1419_v42 = vpack.c.bf16 %v3481_v24, %v3480_v22  ;;  %v2646_v0 = vpack.c.bf16 %v3709_v58, %v3708_v45 }
 0x10a   : > { %4517 = vmatprep.mubr.bf16.mxu0 %v2631_v51  ;;  %4563 = vmatpush3.bf16.msra.mxu1 %v4951_v43  ;;  %v2634_v23 = vpack.c.bf16 %v3685_v6, %v3684_v14  ;;  %v2644_v51 = vpack.c.bf16 %v3705_v38, %v3704_v36  ;;  %v1420_v43 = vpack.c.bf16 %v3483_v21, %v3482_v4 }
 0x10b   : > { %4556 = vmatprep.subr.bf16.mxu1 %v4952_v59 }
 0x10e   : > { %4564 = vmatpush3.bf16.msra.mxu1 %v4952_v59 }
 0x110   : > { %4294 = vmatmul.mubr.bf16.gmra.mrb[16].mxu1 %v5506_v15  ;;  %v3688_v15 = vld [vmem:[%s5192_s9 + $0xaa] sm:$0xff] }
 0x111   : > { %4518 = vmatmul.mubr.bf16.vlgmr.msra.gmra.mrb[0].mxu0 %v2632_v9  ;;  %4297 = vmatprep.mubr.bf16.mxu1 %v5524_v29  ;;  %v3689_v29 = vld [vmem:[%s5192_s9 + $0xb2] sm:$0xff] }
 0x112   : > { %4521 = vmatprep.mubr.bf16.mxu0 %v2633_v61  ;;  %v2636_v25 = vpack.c.bf16 %v3689_v29, %v3688_v15 }
 0x118   : > { %4298 = vmatmul.mubr.bf16.gmra.mrb[20].mxu1 %v5526_v30  ;;  %v3692_v30 = vld [vmem:[%s5192_s9 + $0xda] sm:$0xff] }
 0x119   : > { %4522 = vmatmul.mubr.bf16.gmra.mrb[4].mxu0 %v2634_v23  ;;  %4301 = vmatprep.mubr.bf16.mxu1 %v5542_v40  ;;  %v3693_v40 = vld [vmem:[%s5192_s9 + $0xe2] sm:$0xff] }
 0x11a   : > { %4525 = vmatprep.mubr.bf16.mxu0 %v2635_v16  ;;  %v2638_v31 = vpack.c.bf16 %v3693_v40, %v3692_v30 }
 0x120   : > { %4302 = vmatmul.mubr.bf16.gmra.mrb[24].mxu1 %v5544_v41  ;;  %v1414_v41 = vpack.c.bf16 %v3471_v37, %v3470_v20 }
 0x121   : > { %4526 = vmatmul.mubr.bf16.gmra.mrb[8].mxu0 %v2636_v25  ;;  %4305 = vmatprep.mubr.bf16.mxu1 %v5560_v56  ;;  %v3472_v56 = vld [vmem:[%s5192_s9 + $0xf1] sm:$0xff]  ;;  %s5766_s9 = sand.u32 1, %s5067_s16  }
 0x122   : > { %4529 = vmatprep.mubr.bf16.mxu0 %v2637_v19  ;;  %s3340_s22 = sshll.u32 %s5766_s9, 7  ;;  %s3174_s6 = scalar_lea.sflag [#allocation3], %s5766_s9 }
 0x123   : > { %s5769_s23 = scalar_lea.vmem [#allocation2], %s3340_s22 }
 0x124   : > { %s3195_s28 = sshll.u32 %s5769_s23, 4  ;;  %s5797_s28 = int_to_ptr.vmem [resolvable:$true] %s3195_s28 }
 0x125   : > { %s4953_s7 = scalar_lea.vmem %s5797_s28, 2048  ;;  %p4960_p0 = scmp.lt.s32.totalorder %s5797_s28, %s4958_s10 }
 0x126   : > { %p4954_p11 = scmp.ne.s32.totalorder %s5797_s28, %s4953_s7  ;;  %p4961_p1 = scmp.lt.s32.totalorder %s4959_s11, %s4953_s7 }
 0x128   : > { %4306 = vmatmul.mubr.bf16.gmra.mrb[28].mxu1 %v5594_v13  ;;  %v1415_v13 = vpack.c.bf16 %v3473_v33, %v3472_v56  ;;  %p4955_p12 = pnand %p4954_p11, %p5147_p5  ;;  %p4962_p2 = por %p4961_p1, %p4960_p0 }
 0x129   : > { %4530 = vmatmul.mubr.bf16.gmra.mrb[12].mxu0 %v2638_v31  ;;  %4341 = vmatprep.mubr.bf16.mxu1 %v1414_v41 }
 0x12a   : > { %4533 = vmatprep.mubr.bf16.mxu0 %v2639_v32  ;;  %p4956_p13 = pneg %p4955_p12 }
 0x12c   : > { %p4963_p3 = pnand %p4962_p2, %p4956_p13 }
 0x130   : > { %4342 = vmatmul.mubr.bf16.vlgmr.msra.gmra.mrb[16].mxu1 %v1415_v13 }
 0x131   : > { %4534 = vmatmul.mubr.bf16.gmra.mrb[16].mxu0 %v2640_v48  ;;  %4345 = vmatprep.mubr.bf16.mxu1 %v1416_v50 }
 0x132   : > { %4537 = vmatprep.mubr.bf16.mxu0 %v2641_v53 }
 0x138   : > { %4346 = vmatmul.mubr.bf16.gmra.mrb[20].mxu1 %v1417_v8 }
 0x139   : > { %4538 = vmatmul.mubr.bf16.gmra.mrb[20].mxu0 %v2642_v49  ;;  %4349 = vmatprep.mubr.bf16.mxu1 %v1418_v7 }
 0x13a   : > { %4541 = vmatprep.mubr.bf16.mxu0 %v2643_v10 }
 0x140   : > { %4350 = vmatmul.mubr.bf16.gmra.mrb[24].mxu1 %v1419_v42 }
 0x141   : > { %4542 = vmatmul.mubr.bf16.gmra.mrb[24].mxu0 %v2644_v51  ;;  %4353 = vmatprep.mubr.bf16.mxu1 %v1420_v43 }
 0x142   : > { %4545 = vmatprep.mubr.bf16.mxu0 %v2645_v44 }
 0x148   : > { %4354 = vmatmul.mubr.bf16.gmra.mrb[28].mxu1 %v5679_v2 }
 0x149   : > { %4546 = vmatmul.mubr.bf16.gmra.mrb[28].mxu0 %v2646_v0 }
 0x1c3   : > { %v4279_v59 = vpop.f32.mrb[0].mxu1 }
 0x1c4   : > { %v1215_v9 = vpop.f32.mrb[1].mxu1 }
 0x1c5   : > { %v4280_v61 = vpop.f32.mrb[2].mxu1 }
 0x1c6   : > { %v1218_v14 = vpop.f32.mrb[3].mxu1 }
 0x1cb   : > { %v4283_v6 = vpop.f32.mrb[4].mxu1 }
 0x1cc   : > { %v1231_v12 = vpop.f32.mrb[5].mxu1 }
 0x1cd   : > { %v4284_v11 = vpop.f32.mrb[6].mxu1 }
 0x1ce   : > { %v1234_v23 = vpop.f32.mrb[7].mxu1 }
 0x1d3   : > { %v4287_v16 = vpop.f32.mrb[8].mxu1 }
 0x1d4   : > { %v1247_v15 = vpop.f32.mrb[9].mxu1 }
 0x1d5   : > { %v4288_v29 = vpop.f32.mrb[10].mxu1 }
 0x1d6   : > { %v5755_v17 = vpop.f32.mrb[11].mxu1 }
 0x1db   : > { %v5757_v18 = vpop.f32.mrb[12].mxu1 }
 0x1dc   : > { %v5759_v25 = vpop.f32.mrb[13].mxu1 }
 0x1dd   : > { %v5761_v2 = vpop.f32.mrb[14].mxu1 }
 0x1de   : > { %v5763_v19 = vpop.f32.mrb[15].mxu1 }
 0x1e4   : > { %v4519_v30 = vpop.f32.mrb[0].mxu0 }
 0x1e5   : > { %v4565_v40 = vadd.f32 %v4519_v30, %v4279_v59  ;;  %v2746_v20 = vpop.f32.mrb[1].mxu0 }
 0x1e6   : > { %v4566_v37 = vadd.f32 %v2746_v20, %v1215_v9  ;;  %v4520_v28 = vpop.f32.mrb[2].mxu0 }
 0x1e7   : > { %v4567_v1 = vadd.f32 %v4520_v28, %v4280_v61  ;;  %v2749_v31 = vpop.f32.mrb[3].mxu0  ;;  %v2945_v52 = vmul.f32 %v4565_v40, %v4565_v40 }
 0x1e8   : > { %v4568_v41 = vadd.f32 %v2749_v31, %v1218_v14  ;;  %v2943_v56 = vmul.f32 %v4566_v37, %v4566_v37 }
 0x1e9   : > { %v3814_v32 = vpack.c.bf16 %v4567_v1, %v4565_v40  ;;  %v2946_v50 = vmul.f32 %v4567_v1, %v4567_v1 }
 0x1ea   : > { %v2905_v33 = vadd.f32 %v4568_v41, %v4566_v37  ;;  %v2944_v34 = vmul.f32 %v4568_v41, %v4568_v41  ;;  %v3809_v39 = vpack.c.bf16 %v4568_v41, %v4566_v37 }
 0x1eb   : > { %3886 = vst [vmem:[%s5769_s23 + $0x8] sm:$0xff] %v3814_v32  }
 0x1ec   : > { %v2906_v35 = vadd.f32 %v4565_v40, %v2905_v33  ;;  %v2975_v46 = vadd.f32 %v2944_v34, %v2943_v56  ;;  %3810 = vst [vmem:[%s5769_s23] sm:$0xff] %v3809_v39   ;;  %v4523_v47 = vpop.f32.mrb[4].mxu0 }
 0x1ed   : > { %v4569_v13 = vadd.f32 %v4523_v47, %v4283_v6  ;;  %v2762_v48 = vpop.f32.mrb[5].mxu0 }
 0x1ee   : > { %v2976_v53 = vadd.f32 %v2975_v46, %v2945_v52  ;;  %v4570_v55 = vadd.f32 %v2762_v48, %v1231_v12  ;;  %v2907_v54 = vadd.f32 %v4567_v1, %v2906_v35  ;;  %v4524_v3 = vpop.f32.mrb[6].mxu0 }
 0x1ef   : > { %v4571_v57 = vadd.f32 %v4524_v3, %v4284_v11  ;;  %v2765_v60 = vpop.f32.mrb[7].mxu0  ;;  %v2949_v36 = vmul.f32 %v4569_v13, %v4569_v13 }
 0x1f0   : > { %v2908_v62 = vadd.f32 %v4570_v55, %v2907_v54  ;;  %v2947_v63 = vmul.f32 %v4570_v55, %v4570_v55  ;;  %v2977_v5 = vadd.f32 %v2976_v53, %v2946_v50  ;;  %v4572_v8 = vadd.f32 %v2765_v60, %v1234_v23 }
 0x1f1   : > { %v3824_v49 = vpack.c.bf16 %v4571_v57, %v4569_v13  ;;  %v2950_v42 = vmul.f32 %v4571_v57, %v4571_v57 }
 0x1f2   : > { %v2978_v7 = vadd.f32 %v2977_v5, %v2947_v63  ;;  %v2909_v10 = vadd.f32 %v4572_v8, %v2908_v62  ;;  %v2948_v22 = vmul.f32 %v4572_v8, %v4572_v8  ;;  %v3819_v24 = vpack.c.bf16 %v4572_v8, %v4570_v55 }
 0x1f3   : > { %3888 = vst [vmem:[%s5769_s23 + $0x18] sm:$0xff] %v3824_v49  }
 0x1f4   : > { %v2910_v38 = vadd.f32 %v4569_v13, %v2909_v10  ;;  %v2979_v4 = vadd.f32 %v2978_v7, %v2948_v22  ;;  %3887 = vst [vmem:[%s5769_s23 + $0x10] sm:$0xff] %v3819_v24   ;;  %v4527_v21 = vpop.f32.mrb[8].mxu0 }
 0x1f5   : > { %v4573_v26 = vadd.f32 %v4527_v21, %v4287_v16  ;;  %v2778_v27 = vpop.f32.mrb[9].mxu0 }
 0x1f6   : > { %v2980_v51 = vadd.f32 %v2979_v4, %v2949_v36  ;;  %v4574_v43 = vadd.f32 %v2778_v27, %v1247_v15  ;;  %v2911_v44 = vadd.f32 %v4571_v57, %v2910_v38  ;;  %v4528_v45 = vpop.f32.mrb[10].mxu0 }
 0x1f7   : > { %v4575_v58 = vadd.f32 %v4528_v45, %v4288_v29  ;;  %v2781_v0 = vpop.f32.mrb[11].mxu0  ;;  %v2953_v30 = vmul.f32 %v4573_v26, %v4573_v26 }
 0x1f8   : > { %v2912_v59 = vadd.f32 %v4574_v43, %v2911_v44  ;;  %v2951_v9 = vmul.f32 %v4574_v43, %v4574_v43  ;;  %v2981_v61 = vadd.f32 %v2980_v51, %v2950_v42  ;;  %v4576_v14 = vadd.f32 %v2781_v0, %v5755_v17 }
 0x1f9   : > { %v3834_v6 = vpack.c.bf16 %v4575_v58, %v4573_v26  ;;  %v2954_v28 = vmul.f32 %v4575_v58, %v4575_v58 }
 0x1fa   : > { %v2982_v12 = vadd.f32 %v2981_v61, %v2951_v9  ;;  %v2913_v11 = vadd.f32 %v4576_v14, %v2912_v59  ;;  %v2952_v23 = vmul.f32 %v4576_v14, %v4576_v14  ;;  %v3829_v16 = vpack.c.bf16 %v4576_v14, %v4574_v43 }
 0x1fb   : > { %3890 = vst [vmem:[%s5769_s23 + $0x28] sm:$0xff] %v3834_v6  }
 0x1fc   : > { %v2914_v40 = vadd.f32 %v4573_v26, %v2913_v11  ;;  %v2983_v20 = vadd.f32 %v2982_v12, %v2952_v23  ;;  %3889 = vst [vmem:[%s5769_s23 + $0x20] sm:$0xff] %v3829_v16   ;;  %v4531_v15 = vpop.f32.mrb[12].mxu0 }
 0x1fd   : > { %v4577_v37 = vadd.f32 %v4531_v15, %v5757_v18  ;;  %v2794_v29 = vpop.f32.mrb[13].mxu0 }
 0x1fe   : > { %v2984_v1 = vadd.f32 %v2983_v20, %v2953_v30  ;;  %v4578_v31 = vadd.f32 %v2794_v29, %v5759_v25  ;;  %v2915_v17 = vadd.f32 %v4575_v58, %v2914_v40  ;;  %v4532_v41 = vpop.f32.mrb[14].mxu0 }
 0x1ff   : > { %v4579_v32 = vadd.f32 %v4532_v41, %v5761_v2  ;;  %v2797_v56 = vpop.f32.mrb[15].mxu0  ;;  %v2957_v50 = vmul.f32 %v4577_v37, %v4577_v37 }
 0x200   : > { %v2916_v33 = vadd.f32 %v4578_v31, %v2915_v17  ;;  %v2955_v34 = vmul.f32 %v4578_v31, %v4578_v31  ;;  %v2985_v39 = vadd.f32 %v2984_v1, %v2954_v28  ;;  %v4580_v52 = vadd.f32 %v2797_v56, %v5763_v19 }
 0x201   : > { %v3844_v35 = vpack.c.bf16 %v4579_v32, %v4577_v37  ;;  %v2958_v60 = vmul.f32 %v4579_v32, %v4579_v32 }
 0x202   : > { %v2986_v46 = vadd.f32 %v2985_v39, %v2955_v34  ;;  %v2917_v18 = vadd.f32 %v4580_v52, %v2916_v33  ;;  %v2956_v47 = vmul.f32 %v4580_v52, %v4580_v52  ;;  %v3839_v13 = vpack.c.bf16 %v4580_v52, %v4578_v31 }
 0x203   : > { %3892 = vst [vmem:[%s5769_s23 + $0x38] sm:$0xff] %v3844_v35   ;;  %v4343_v48 = vpop.f32.mrb[16].mxu1 }
 0x204   : > { %v2918_v25 = vadd.f32 %v4577_v37, %v2917_v18  ;;  %v2987_v53 = vadd.f32 %v2986_v46, %v2956_v47  ;;  %3891 = vst [vmem:[%s5769_s23 + $0x30] sm:$0xff] %v3839_v13   ;;  %v4535_v55 = vpop.f32.mrb[16].mxu0  ;;  %v1585_v2 = vpop.f32.mrb[17].mxu1 }
 0x205   : > { %v4581_v54 = vadd.f32 %v4535_v55, %v4343_v48  ;;  %v2810_v3 = vpop.f32.mrb[17].mxu0  ;;  %v4344_v57 = vpop.f32.mrb[18].mxu1 }
 0x206   : > { %v2988_v62 = vadd.f32 %v2987_v53, %v2957_v50  ;;  %v4582_v19 = vadd.f32 %v2810_v3, %v1585_v2  ;;  %v2919_v63 = vadd.f32 %v4579_v32, %v2918_v25  ;;  %v4536_v5 = vpop.f32.mrb[18].mxu0  ;;  %v1588_v8 = vpop.f32.mrb[19].mxu1 }
 0x207   : > { %v4583_v49 = vadd.f32 %v4536_v5, %v4344_v57  ;;  %v2813_v7 = vpop.f32.mrb[19].mxu0  ;;  %v2961_v51 = vmul.f32 %v4581_v54, %v4581_v54 }
 0x208   : > { %v2920_v10 = vadd.f32 %v4582_v19, %v2919_v63  ;;  %v2959_v22 = vmul.f32 %v4582_v19, %v4582_v19  ;;  %v2989_v24 = vadd.f32 %v2988_v62, %v2958_v60  ;;  %v4584_v36 = vadd.f32 %v2813_v7, %v1588_v8 }
 0x209   : > { %v3854_v38 = vpack.c.bf16 %v4583_v49, %v4581_v54  ;;  %v2962_v61 = vmul.f32 %v4583_v49, %v4583_v49 }
 0x20a   : > { %v2990_v4 = vadd.f32 %v2989_v24, %v2959_v22  ;;  %v2921_v21 = vadd.f32 %v4584_v36, %v2920_v10  ;;  %v2960_v26 = vmul.f32 %v4584_v36, %v4584_v36  ;;  %v3849_v27 = vpack.c.bf16 %v4584_v36, %v4582_v19 }
 0x20b   : > { %3894 = vst [vmem:[%s5769_s23 + $0x48] sm:$0xff] %v3854_v38   ;;  %v4347_v42 = vpop.f32.mrb[20].mxu1 }
 0x20c   : > { %v2922_v43 = vadd.f32 %v4581_v54, %v2921_v21  ;;  %v2991_v44 = vadd.f32 %v2990_v4, %v2960_v26  ;;  %3893 = vst [vmem:[%s5769_s23 + $0x40] sm:$0xff] %v3849_v27   ;;  %v4539_v45 = vpop.f32.mrb[20].mxu0  ;;  %v1601_v58 = vpop.f32.mrb[21].mxu1 }
 0x20d   : > { %v4585_v0 = vadd.f32 %v4539_v45, %v4347_v42  ;;  %v2826_v59 = vpop.f32.mrb[21].mxu0  ;;  %v4348_v9 = vpop.f32.mrb[22].mxu1 }
 0x20e   : > { %v2992_v14 = vadd.f32 %v2991_v44, %v2961_v51  ;;  %v4586_v6 = vadd.f32 %v2826_v59, %v1601_v58  ;;  %v2923_v12 = vadd.f32 %v4583_v49, %v2922_v43  ;;  %v4540_v11 = vpop.f32.mrb[22].mxu0  ;;  %v1604_v23 = vpop.f32.mrb[23].mxu1 }
 0x20f   : > { %v4587_v16 = vadd.f32 %v4540_v11, %v4348_v9  ;;  %v2829_v30 = vpop.f32.mrb[23].mxu0  ;;  %v2965_v32 = vmul.f32 %v4585_v0, %v4585_v0 }
 0x210   : > { %v2924_v40 = vadd.f32 %v4586_v6, %v2923_v12  ;;  %v2963_v20 = vmul.f32 %v4586_v6, %v4586_v6  ;;  %v2993_v15 = vadd.f32 %v2992_v14, %v2962_v61  ;;  %v4588_v37 = vadd.f32 %v2829_v30, %v1604_v23 }
 0x211   : > { %v3864_v29 = vpack.c.bf16 %v4587_v16, %v4585_v0  ;;  %v2966_v18 = vmul.f32 %v4587_v16, %v4587_v16 }
 0x212   : > { %v2994_v28 = vadd.f32 %v2993_v15, %v2963_v20  ;;  %v2925_v1 = vadd.f32 %v4588_v37, %v2924_v40  ;;  %v2964_v31 = vmul.f32 %v4588_v37, %v4588_v37  ;;  %v3859_v17 = vpack.c.bf16 %v4588_v37, %v4586_v6 }
 0x213   : > { %3896 = vst [vmem:[%s5769_s23 + $0x58] sm:$0xff] %v3864_v29   ;;  %v4351_v41 = vpop.f32.mrb[24].mxu1 }
 0x214   : > { %v2926_v56 = vadd.f32 %v4585_v0, %v2925_v1  ;;  %v2995_v33 = vadd.f32 %v2994_v28, %v2964_v31  ;;  %3895 = vst [vmem:[%s5769_s23 + $0x50] sm:$0xff] %v3859_v17   ;;  %v4543_v34 = vpop.f32.mrb[24].mxu0  ;;  %v1617_v39 = vpop.f32.mrb[25].mxu1 }
 0x215   : > { %v4589_v52 = vadd.f32 %v4543_v34, %v4351_v41  ;;  %v2842_v35 = vpop.f32.mrb[25].mxu0  ;;  %v4352_v46 = vpop.f32.mrb[26].mxu1 }
 0x216   : > { %v2996_v47 = vadd.f32 %v2995_v33, %v2965_v32  ;;  %v4590_v13 = vadd.f32 %v2842_v35, %v1617_v39  ;;  %v2927_v48 = vadd.f32 %v4587_v16, %v2926_v56  ;;  %v4544_v50 = vpop.f32.mrb[26].mxu0  ;;  %v1620_v25 = vpop.f32.mrb[27].mxu1 }
 0x217   : > { %v4591_v53 = vadd.f32 %v4544_v50, %v4352_v46  ;;  %v2845_v55 = vpop.f32.mrb[27].mxu0  ;;  %v2969_v49 = vmul.f32 %v4589_v52, %v4589_v52 }
 0x218   : > { %v2928_v2 = vadd.f32 %v4590_v13, %v2927_v48  ;;  %v2967_v54 = vmul.f32 %v4590_v13, %v4590_v13  ;;  %v2997_v3 = vadd.f32 %v2996_v47, %v2966_v18  ;;  %v4592_v57 = vadd.f32 %v2845_v55, %v1620_v25 }
 0x219   : > { %v3874_v60 = vpack.c.bf16 %v4591_v53, %v4589_v52  ;;  %v2970_v21 = vmul.f32 %v4591_v53, %v4591_v53 }
 0x21a   : > { %v2998_v62 = vadd.f32 %v2997_v3, %v2967_v54  ;;  %v2929_v19 = vadd.f32 %v4592_v57, %v2928_v2  ;;  %v2968_v63 = vmul.f32 %v4592_v57, %v4592_v57  ;;  %v3869_v5 = vpack.c.bf16 %v4592_v57, %v4590_v13 }
 0x21b   : > { %3898 = vst [vmem:[%s5769_s23 + $0x68] sm:$0xff] %v3874_v60   ;;  %v4355_v8 = vpop.f32.mrb[28].mxu1 }
 0x21c   : > { %v2930_v7 = vadd.f32 %v4589_v52, %v2929_v19  ;;  %v2999_v10 = vadd.f32 %v2998_v62, %v2968_v63  ;;  %3897 = vst [vmem:[%s5769_s23 + $0x60] sm:$0xff] %v3869_v5   ;;  %v4547_v22 = vpop.f32.mrb[28].mxu0  ;;  %v1633_v24 = vpop.f32.mrb[29].mxu1 }
 0x21d   : > { %v4593_v36 = vadd.f32 %v4547_v22, %v4355_v8  ;;  %v2858_v38 = vpop.f32.mrb[29].mxu0  ;;  %v4356_v4 = vpop.f32.mrb[30].mxu1 }
 0x21e   : > { %v3000_v26 = vadd.f32 %v2999_v10, %v2969_v49  ;;  %v4594_v27 = vadd.f32 %v2858_v38, %v1633_v24  ;;  %v2931_v42 = vadd.f32 %v4591_v53, %v2930_v7  ;;  %v4548_v51 = vpop.f32.mrb[30].mxu0  ;;  %v1636_v43 = vpop.f32.mrb[31].mxu1 }
 0x21f   : > { %v4595_v44 = vadd.f32 %v4548_v51, %v4356_v4  ;;  %v2861_v45 = vpop.f32.mrb[31].mxu0  ;;  %v2973_v23 = vmul.f32 %v4593_v36, %v4593_v36 }
 0x220   : > { %v2932_v58 = vadd.f32 %v4594_v27, %v2931_v42  ;;  %v2971_v0 = vmul.f32 %v4594_v27, %v4594_v27  ;;  %v3001_v59 = vadd.f32 %v3000_v26, %v2970_v21  ;;  %v4596_v9 = vadd.f32 %v2861_v45, %v1636_v43 }
 0x221   : > { %v3884_v61 = vpack.c.bf16 %v4595_v44, %v4593_v36 }
 0x222   : > { %v3002_v14 = vadd.f32 %v3001_v59, %v2971_v0  ;;  %v2933_v6 = vadd.f32 %v4596_v9, %v2932_v58  ;;  %v2972_v12 = vmul.f32 %v4596_v9, %v4596_v9  ;;  %v3879_v11 = vpack.c.bf16 %v4596_v9, %v4594_v27 }
 0x223   : > { %3900 = vst [vmem:[%s5769_s23 + $0x78] sm:$0xff] %v3884_v61  }
 0x224   : > { %v2934_v16 = vadd.f32 %v4593_v36, %v2933_v6  ;;  %v3003_v30 = vadd.f32 %v3002_v14, %v2972_v12  ;;  %3899 = vst [vmem:[%s5769_s23 + $0x70] sm:$0xff] %v3879_v11  }
 0x225   : > { %4966 = shalt.err (!%p4963_p3)
}
 0x226   : > { %s4967_s12 = scalar_lea.hbm %s5795_s5, 2048  ;;  %s4971_s22 = scalar_lea.hbm %s5914_s2, 4096 }
 0x227   : > { %p4968_p4 = scmp.ne.s32.totalorder %s5795_s5, %s4967_s12  ;;  %p4972_p9 = scmp.lt.u32.totalorder %s5795_s5, %s5914_s2 }
 0x228   : > { %p4973_p10 = scmp.lt.u32.totalorder %s4971_s22, %s4967_s12  ;;  %p4975_p12 = scmp.lt.u32.totalorder %s4967_s12, %s5795_s5 }
 0x229   : > { %p4969_p7 = pnand %p4968_p4, %p5147_p5 }
 0x22a   : > { %p4974_p11 = por %p4973_p10, %p4972_p9 }
 0x22b   : > { %p4970_p8 = pneg %p4969_p7 }
 0x22c   : > { %p4976_p13 = por %p4975_p12, %p4974_p11 }
 0x22e   : > { %p4977_p0 = pnand %p4976_p13, %p4970_p8 }
 0x230   : > { %4980 = shalt.err (!%p4977_p0)
}
 0x231   : > { %s5078_s29 = smov 64   ;;  %s5079_s30 = smov 4   ;;  %v2974_v40 = vmul.f32 %v4595_v44, %v4595_v44  ;;  %v2935_v20 = vadd.f32 %v4595_v44, %v2934_v16  ;;  %v3004_v15 = vadd.f32 %v3003_v30, %v2973_v23 }
 0x232   : > { %4822 = dma.vmem_to_hbm [thread:$0]  (%p5147_p5), %s5797_s28, 2048, %s5795_s5, %s3174_s6, %s5078_s29, %s5078_s29, %s5079_s30  }
 0x233   : > { %v2936_v37 = vrot.slane %v2935_v20, 4  ;;  %v3005_v29 = vadd.f32 %v3004_v15, %v2974_v40  ;;  %s3178_s7 = sand.u32 1, %s5128_s19   ;;  %s3769_s8 = sshll.u32 %s5128_s19, 4 }
 0x234   : > { %s200_s10 = scalar_lea.vmem [#allocation4], %s5766_s9  ;;  %s206_s28 = scalar_lea.vmem [#allocation6], %s5766_s9 }
 0x235   : > { %v3006_v28 = vrot.slane %v3005_v29, 4  ;;  %v2937_v1 = vadd.f32 %v2936_v37, %v2935_v20  ;;  %s3211_s11 = sshll.u32 %s200_s10, 4  ;;  %s3224_s5 = sshll.u32 %s206_s28, 4  ;;  %s5836_s11 = int_to_ptr.vmem [resolvable:$true] %s3211_s11  ;;  %s5843_s5 = int_to_ptr.vmem [resolvable:$true] %s3224_s5 }
 0x236   : > { %s5834_s13 = scalar_lea.hbm %s5915_s3, %s3769_s8  ;;  %s5841_s22 = scalar_lea.hbm %s5916_s4, %s3769_s8 }
 0x237   : > { %v2938_v31 = vrot.slane %v2937_v1, 2  ;;  %v3007_v17 = vadd.f32 %v3006_v28, %v3005_v29  ;;  %s5845_s23 = scalar_lea.sflag [#allocation5], %s3178_s7  ;;  %s4981_s27 = scalar_lea.vmem %s5836_s11, 16 }
 0x238   : > { %p4982_p1 = scmp.ne.s32.totalorder %s5836_s11, %s4981_s27  ;;  %s5080_s29 = smov [#allocation4]  }
 0x239   : > { %v2939_v41 = vadd.f32 %v2938_v31, %v2937_v1  ;;  %v3008_v32 = vrot.slane %v3007_v17, 2  ;;  %s4985_s30 = sshll.u32 %s5080_s29, 4  ;;  %s4986_s30 = int_to_ptr.vmem [resolvable:$false] %s4985_s30 }
 0x23a   : > { %p4983_p2 = pnand %p4982_p1, %p5147_p5  ;;  %s4987_s6 = scalar_lea.vmem %s4986_s30, 32 }
 0x23b   : > { %v2940_v56 = vrot.slane %v2939_v41, 1  ;;  %v3009_v33 = vadd.f32 %v3008_v32, %v3007_v17  ;;  %p4988_p4 = scmp.lt.s32.totalorder %s5836_s11, %s4986_s30  ;;  %p4989_p7 = scmp.lt.s32.totalorder %s4987_s6, %s4981_s27 }
 0x23c   : > { %p4984_p3 = pneg %p4983_p2 }
 0x23d   : > { %v2941_v34 = vadd.f32 %v2940_v56, %v2939_v41  ;;  %v3010_v39 = vrot.slane %v3009_v33, 1  ;;  %p4990_p8 = por %p4989_p7, %p4988_p4 }
 0x23f   : > { %2942 = vst [vmem:[%s200_s10] sm:$0x1] %v2941_v34  ;;  %v3011_v52 = vadd.f32 %v3010_v39, %v3009_v33  ;;  %p4991_p9 = pnand %p4990_p8, %p4984_p3 }
 0x241   : > { %4994 = shalt.err (!%p4991_p9)
}
 0x242   : > { %s4995_s7 = scalar_lea.hbm %s5834_s13, 16  ;;  %s4999_s12 = scalar_lea.hbm %s5915_s3, 32 }
 0x243   : > { %p4996_p10 = scmp.ne.s32.totalorder %s5834_s13, %s4995_s7  ;;  %p5000_p13 = scmp.lt.u32.totalorder %s5834_s13, %s5915_s3 }
 0x244   : > { %p5001_p0 = scmp.lt.u32.totalorder %s4999_s12, %s4995_s7  ;;  %p5003_p2 = scmp.lt.u32.totalorder %s4995_s7, %s5834_s13 }
 0x245   : > { %p4997_p11 = pnand %p4996_p10, %p5147_p5 }
 0x246   : > { %p5002_p1 = por %p5001_p0, %p5000_p13 }
 0x247   : > { %p4998_p12 = pneg %p4997_p11 }
 0x248   : > { %p5004_p3 = por %p5003_p2, %p5002_p1 }
 0x24a   : > { %p5005_p4 = pnand %p5004_p3, %p4998_p12 }
 0x24c   : > { %5008 = shalt.err (!%p5005_p4)
}
 0x24d   : > { %4823 = dma.vmem_to_hbm [thread:$0]  (%p5147_p5), %s5836_s11, 16, %s5834_s13, %s5845_s23   ;;  %3012 = vst [vmem:[%s206_s28] sm:$0x1] %v3011_v52 }
 0x24e   : > { %s5009_s27 = scalar_lea.vmem %s5843_s5, 16  ;;  %s5081_s29 = smov [#allocation6]  }
 0x24f   : > { %p5010_p7 = scmp.ne.s32.totalorder %s5843_s5, %s5009_s27  ;;  %s5013_s30 = sshll.u32 %s5081_s29, 4  ;;  %s5014_s30 = int_to_ptr.vmem [resolvable:$false] %s5013_s30 }
 0x250   : > { %s5015_s6 = scalar_lea.vmem %s5014_s30, 32  ;;  %p5016_p10 = scmp.lt.s32.totalorder %s5843_s5, %s5014_s30 }
 0x251   : > { %p5011_p8 = pnand %p5010_p7, %p5147_p5  ;;  %p5017_p11 = scmp.lt.s32.totalorder %s5015_s6, %s5009_s27 }
 0x253   : > { %p5012_p9 = pneg %p5011_p8  ;;  %p5018_p12 = por %p5017_p11, %p5016_p10 }
 0x255   : > { %p5019_p13 = pnand %p5018_p12, %p5012_p9 }
 0x257   : > { %5022 = shalt.err (!%p5019_p13)
}
 0x258   : > { %s5023_s9 = scalar_lea.hbm %s5841_s22, 16  ;;  %s5027_s13 = scalar_lea.hbm %s5916_s4, 32 }
 0x259   : > { %p5024_p0 = scmp.ne.s32.totalorder %s5841_s22, %s5023_s9  ;;  %p5028_p3 = scmp.lt.u32.totalorder %s5841_s22, %s5916_s4 }
 0x25a   : > { %p5029_p4 = scmp.lt.u32.totalorder %s5027_s13, %s5023_s9  ;;  %p5031_p8 = scmp.lt.u32.totalorder %s5023_s9, %s5841_s22 }
 0x25b   : > { %p5025_p1 = pnand %p5024_p0, %p5147_p5 }
 0x25c   : > { %p5030_p7 = por %p5029_p4, %p5028_p3 }
 0x25d   : > { %p5026_p2 = pneg %p5025_p1 }
 0x25e   : > { %p5032_p9 = por %p5031_p8, %p5030_p7 }
 0x260   : > { %p5033_p10 = pnand %p5032_p9, %p5026_p2 }
 0x262   : > { %5036 = shalt.err (!%p5033_p10)
}
 0x263   : > { %4824 = dma.vmem_to_hbm [thread:$0]  (%p5147_p5), %s5843_s5, 16, %s5841_s22, %s5845_s23  }
 0x264 PF: > { %p4838_p11 = scmp.ge.s32.totalorder %s5075_s18, 2  ;;  %s3236_s10 = sand.u32 1, %s5063_s15  }
 0x265   : > { %s3237_s12 = scalar_lea.sflag [#allocation3], %s3236_s10 }
 0x266   : > { %p4829_p12 = pnand %p4838_p11, %p5151_p6 }
 0x268   : > { %5054 = dma.done.wait (!%p4829_p12), %s3237_s12, 2048  }
 0x269   : > { %5056 = vsyncadd (!%p4829_p12), %s3237_s12, 4294965248  ;;  %s3245_s19 = sand.u32 1, %s3336_s20  }
 0x26a   : > { %s3246_s14 = scalar_lea.sflag [#allocation5], %s3245_s19 }
 0x26b   : > { %5058 = dma.done.wait (!%p4829_p12), %s3246_s14, 32  }
 0x26c   : > { %5060 = vsyncadd (!%p4829_p12), %s3246_s14, 4294967264  ;;  %p18_p5 = scmp.ge.s32.totalorder %s5132_s21, 4   ;;  %s5919_s15 = smov %s5067_s16 }
 0x26d   : > { %s5920_s16 = smov %s5071_s17  ;;  %s5921_s17 = smov %s5145_s24 }
 0x26e   : > { %s5922_s18 = smov %s5132_s21  ;;  %20 = sbr.rel (!%p18_p5) target bundleno = 5 (0x5), region = 105 }
 0x275   :  { %3258 = vsyncpa [#allocation3], 1 }
 0x276   :  { %3260 = vsyncpa [#allocation3 + $0x1], 1 }
 0x277   :  { %3261 = vsyncpa [#allocation5], 1 }
 0x278   :  { %3263 = vsyncpa [#allocation5 + $0x1], 1 }

</bundles_post_ra>
